<compile_context>
chip_gen: v7x
topology: tpu7x:2x2x1
jax: 0.10.0
libtpu: 0.0.40
codegen_flags: <defaults>
</compile_context>

<pallas_src>
import jax
import jax.numpy as jnp
from jax.experimental import pallas as pl
from jax.experimental.pallas import tpu as pltpu


def mlp_kernel(x_ref, w1_ref, b1_ref, w2_ref, b2_ref, w3_ref, b3_ref,
               o_ref, acc_ref):
    k = pl.program_id(0)

    @pl.when(k == 0)
    def _():
        acc_ref[...] = jnp.zeros_like(acc_ref)

    # fc1 partial: accumulate x-chunk @ w1-block (bf16 x bf16 -> f32 acc).
    # x is resident as (K//tk, Bp, tk); dynamic index on the leading dim.
    x_blk = x_ref[k]
    acc_ref[...] += jnp.dot(x_blk, w1_ref[...],
                            preferred_element_type=jnp.float32)

    @pl.when(k == pl.num_programs(0) - 1)
    def _():
        # fc1 bias (BN1 folded) -> relu
        h1 = jnp.maximum(acc_ref[...] + b1_ref[...], 0.0)
        # fc2 -> dropout(eval: identity) -> bn2(folded) -> relu
        h2 = jnp.dot(h1.astype(jnp.bfloat16), w2_ref[...],
                     preferred_element_type=jnp.float32) + b2_ref[...]
        h2 = jnp.maximum(h2, 0.0)
        # fc3 (logits, lane-padded)
        o_ref[...] = jnp.dot(h2.astype(jnp.bfloat16), w3_ref[...],
                             preferred_element_type=jnp.float32) + b3_ref[...]


def mlp_forward(x, folded, classes, tk=1024):
    """x: (B, 3, 1024) float32. folded: bf16 weights + f32 biases. -> (B, classes)."""
    B = x.shape[0]
    w1, b1, w2, b2, w3, b3 = folded
    K, N1 = w1.shape          # 3072, 512
    N2 = w2.shape[1]          # 256
    Cp = w3.shape[1]          # classes padded to multiple of 128

    assert K % tk == 0, f"tk={tk} must divide K={K} (K-tail would be dropped)"
    Kt = K // tk

    # nn.Flatten -> (B, 3072), bf16 activations.
    x_flat = x.reshape(B, -1).astype(jnp.bfloat16)

    # Pad batch to a sublane multiple (>=8): unmasked f32 output store and
    # amortizes the per-call weight stream over more MXU rows.
    Bp = max(8, ((B + 7) // 8) * 8)
    if Bp != B:
        x_flat = jnp.zeros((Bp, K), jnp.bfloat16).at[:B, :].set(x_flat)

    # Resident layout for x: (Kt, Bp, tk) so the kernel indexes x_ref[k].
    x_res = x_flat.reshape(Bp, Kt, tk).transpose(1, 0, 2)

    flops = 2 * Bp * (K * N1 + N1 * N2 + N2 * Cp)
    bytes_accessed = (w1.size + w2.size + w3.size) * 2 \
        + (b1.size + b2.size + b3.size) * 4 \
        + x_res.size * 2 + Bp * Cp * 4

    out = pl.pallas_call(
        mlp_kernel,
        out_shape=jax.ShapeDtypeStruct((Bp, Cp), jnp.float32),
        grid_spec=pltpu.PrefetchScalarGridSpec(
            num_scalar_prefetch=0,
            grid=(Kt,),
            in_specs=[
                pl.BlockSpec((Kt, Bp, tk), lambda k: (0, 0, 0)),  # x  : resident
                pl.BlockSpec((tk, N1), lambda k: (k, 0)),         # w1 : stream over K
                pl.BlockSpec((1, N1), lambda k: (0, 0)),          # b1 : resident
                pl.BlockSpec((N1, N2), lambda k: (0, 0)),         # w2 : resident
                pl.BlockSpec((1, N2), lambda k: (0, 0)),          # b2 : resident
                pl.BlockSpec((N2, Cp), lambda k: (0, 0)),         # w3 : resident
                pl.BlockSpec((1, Cp), lambda k: (0, 0)),          # b3 : resident
            ],
            out_specs=pl.BlockSpec((Bp, Cp), lambda k: (0, 0)),
            scratch_shapes=[pltpu.VMEM((Bp, N1), jnp.float32)],
        ),
        compiler_params=pltpu.CompilerParams(
            dimension_semantics=("arbitrary",)),
        cost_estimate=pl.CostEstimate(
            flops=flops, transcendentals=0, bytes_accessed=bytes_accessed),
    )(x_res, w1, b1, w2, b2, w3, b3)
    return out[:B, :classes]


def init_params(key, classes=10):
    """PyTorch-default-like init. Returns (w, b, s, t) per layer with BN affine
    already reduced to scale/shift (eval-mode running stats: mean=0, var=1)."""
    dims = [(3072, 512), (512, 256), (256, classes)]
    keys = jax.random.split(key, 2 * len(dims))
    params = []
    eps = 1e-5
    for li, (fan_in, fan_out) in enumerate(dims):
        bound = 1.0 / (fan_in ** 0.5)
        w = jax.random.uniform(keys[2 * li], (fan_in, fan_out),
                               jnp.float32, -bound, bound)
        b = jax.random.uniform(keys[2 * li + 1], (1, fan_out),
                               jnp.float32, -bound, bound)
        params += [w, b]
        if li < 2:  # BN after fc1 and fc2
            gamma = jnp.ones((1, fan_out), jnp.float32)
            beta = jnp.zeros((1, fan_out), jnp.float32)
            running_mean = jnp.zeros((1, fan_out), jnp.float32)
            running_var = jnp.ones((1, fan_out), jnp.float32)
            s = gamma * jax.lax.rsqrt(running_var + eps)
            t = beta - running_mean * s
            params += [s, t]
    return tuple(params)


def fold_params(params):
    """Fold BN affine + bias into the weights; cast weights to bf16; pad the
    logits dim to a multiple of 128 lanes for an unmasked store."""
    w1, b1, s1, t1, w2, b2, s2, t2, w3, b3 = params
    w1f = (w1 * s1).astype(jnp.bfloat16)
    b1f = b1 * s1 + t1
    w2f = (w2 * s2).astype(jnp.bfloat16)
    b2f = b2 * s2 + t2
    C = w3.shape[1]
    Cp = ((C + 127) // 128) * 128
    w3p = jnp.zeros((w3.shape[0], Cp), jnp.float32).at[:, :C].set(w3)
    b3p = jnp.zeros((1, Cp), jnp.float32).at[:, :C].set(b3)
    return w1f, b1f, w2f, b2f, w3p.astype(jnp.bfloat16), b3p


def mlp_reference_f32(x, params):
    """Exact eval-mode PyTorch semantics in f32."""
    (w1, b1, s1, t1, w2, b2, s2, t2, w3, b3) = params
    xf = x.reshape(x.shape[0], -1)
    h1 = jnp.maximum((xf @ w1 + b1) * s1 + t1, 0.0)
    h2 = jnp.maximum((h1 @ w2 + b2) * s2 + t2, 0.0)
    return h2 @ w3 + b3


def mlp_reference_bf16(x, folded, classes):
    """Same bf16-weight / f32-accumulate numerics as the kernel."""
    w1, b1, w2, b2, w3, b3 = folded
    xf = x.reshape(x.shape[0], -1).astype(jnp.bfloat16)
    h1 = jnp.maximum(jnp.dot(xf, w1, preferred_element_type=jnp.float32) + b1, 0.0)
    h2 = jnp.maximum(
        jnp.dot(h1.astype(jnp.bfloat16), w2, preferred_element_type=jnp.float32) + b2, 0.0)
    out = jnp.dot(h2.astype(jnp.bfloat16), w3, preferred_element_type=jnp.float32) + b3
    return out[:, :classes]


if __name__ == "__main__":
    key = jax.random.PRNGKey(0)
    k_x, k_p = jax.random.split(key)

    B, classes = 4, 10
    x = jax.random.normal(k_x, (B, 3, 1024), jnp.float32)  # (B, C=3, N=1024) -> 3072
    params = init_params(k_p, classes=classes)
    folded = fold_params(params)

    out = mlp_forward(x, folded, classes)
    out = jax.block_until_ready(out)
    assert out.shape == (B, classes)

    # Tight check vs a reference using identical bf16 numerics.
    ref_bf16 = mlp_reference_bf16(x, folded, classes)
    assert jnp.allclose(out, ref_bf16, atol=2e-3, rtol=2e-3), "mismatch vs bf16 reference"

    # Loose sanity check vs the exact f32 eval-mode module semantics.
    ref_f32 = mlp_reference_f32(x, params)
    assert jnp.allclose(out, ref_f32, atol=1e-1, rtol=1e-1), "mismatch vs f32 reference"

    print("KERNEL_OK")
</pallas_src>

<mosaic_0001>
module attributes {stable_mosaic.version = 11 : i64} {
  func.func @mlp_kernel(%arg0: i32, %arg1: memref<3x8x1024xbf16, #tpu.memory_space<vmem>>, %arg2: memref<1024x512xbf16, #tpu.memory_space<vmem>>, %arg3: memref<1x512xf32, #tpu.memory_space<vmem>>, %arg4: memref<512x256xbf16, #tpu.memory_space<vmem>>, %arg5: memref<1x256xf32, #tpu.memory_space<vmem>>, %arg6: memref<256x128xbf16, #tpu.memory_space<vmem>>, %arg7: memref<1x128xf32, #tpu.memory_space<vmem>>, %arg8: memref<8x128xf32, #tpu.memory_space<vmem>>, %arg9: memref<8x512xf32, #tpu.memory_space<vmem>>) attributes {dimension_semantics = [#tpu.dimension_semantics<arbitrary>], iteration_bounds = array<i64: 3>, scalar_prefetch = 0 : i64, scratch_operands = 1 : i64, tpu.core_type = #tpu.core_type<tc>, window_params = [{pipeline_mode = #tpu.pipeline_mode<synchronous>, transform_indices = @transform_0, window_bounds = array<i64: 3, 8, 1024>}, {transform_indices = @transform_1, window_bounds = array<i64: 1024, 512>}, {pipeline_mode = #tpu.pipeline_mode<synchronous>, transform_indices = @transform_2, window_bounds = array<i64: 1, 512>}, {pipeline_mode = #tpu.pipeline_mode<synchronous>, transform_indices = @transform_3, window_bounds = array<i64: 512, 256>}, {pipeline_mode = #tpu.pipeline_mode<synchronous>, transform_indices = @transform_4, window_bounds = array<i64: 1, 256>}, {pipeline_mode = #tpu.pipeline_mode<synchronous>, transform_indices = @transform_5, window_bounds = array<i64: 256, 128>}, {pipeline_mode = #tpu.pipeline_mode<synchronous>, transform_indices = @transform_6, window_bounds = array<i64: 1, 128>}, {pipeline_mode = #tpu.pipeline_mode<synchronous>, transform_indices = @transform_7, window_bounds = array<i64: 8, 128>}]} {
    %c0_i32 = arith.constant 0 : i32
    %0 = arith.cmpi eq, %arg0, %c0_i32 : i32
    %1 = arith.extui %0 : i1 to i32
    %c0_i32_0 = arith.constant 0 : i32
    %2 = arith.cmpi ne, %1, %c0_i32_0 : i32
    scf.if %2 {
      %cst_9 = arith.constant 0.000000e+00 : f32
      %14 = vector.broadcast %cst_9 : f32 to vector<8x512xf32>
      %c0_10 = arith.constant 0 : index
      %c0_11 = arith.constant 0 : index
      %15 = vector.load %arg9[%c0_10, %c0_11] : memref<8x512xf32, #tpu.memory_space<vmem>>, vector<8x512xf32>
      tpu.vector_store %arg9[%c0_10, %c0_11], %14 {strides = array<i32>} : memref<8x512xf32, #tpu.memory_space<vmem>>, vector<8x512xf32>,
    } else {
    }
    %3 = arith.index_cast %arg0 : i32 to index
    %c0 = arith.constant 0 : index
    %c0_1 = arith.constant 0 : index
    %4 = vector.load %arg1[%3, %c0, %c0_1] : memref<3x8x1024xbf16, #tpu.memory_space<vmem>>, vector<1x8x1024xbf16>
    %5 = vector.shape_cast %4 : vector<1x8x1024xbf16> to vector<8x1024xbf16>
    %c0_2 = arith.constant 0 : index
    %c0_3 = arith.constant 0 : index
    %6 = vector.load %arg9[%c0_2, %c0_3] : memref<8x512xf32, #tpu.memory_space<vmem>>, vector<8x512xf32>
    %c0_4 = arith.constant 0 : index
    %c0_5 = arith.constant 0 : index
    %7 = vector.load %arg2[%c0_4, %c0_5] : memref<1024x512xbf16, #tpu.memory_space<vmem>>, vector<1024x512xbf16>
    %cst = arith.constant dense<0.000000e+00> : vector<8x512xf32>
    %8 = tpu.matmul %5, %7, %cst {dimension_numbers = #tpu.dot_dimension_numbers<[1], [0], [0], [1], [0, 0, 1, 1], [], []>} : vector<8x1024xbf16>, vector<1024x512xbf16>, vector<8x512xf32> -> vector<8x512xf32>
    %9 = arith.addf %6, %8 : vector<8x512xf32>
    %c0_6 = arith.constant 0 : index
    %c0_7 = arith.constant 0 : index
    %10 = vector.load %arg9[%c0_6, %c0_7] : memref<8x512xf32, #tpu.memory_space<vmem>>, vector<8x512xf32>
    tpu.vector_store %arg9[%c0_6, %c0_7], %9 {strides = array<i32>} : memref<8x512xf32, #tpu.memory_space<vmem>>, vector<8x512xf32>,
    %c2_i32 = arith.constant 2 : i32
    %11 = arith.cmpi eq, %arg0, %c2_i32 : i32
    %12 = arith.extui %11 : i1 to i32
    %c0_i32_8 = arith.constant 0 : i32
    %13 = arith.cmpi ne, %12, %c0_i32_8 : i32
    scf.if %13 {
      %c0_9 = arith.constant 0 : index
      %c0_10 = arith.constant 0 : index
      %14 = vector.load %arg9[%c0_9, %c0_10] : memref<8x512xf32, #tpu.memory_space<vmem>>, vector<8x512xf32>
      %c0_11 = arith.constant 0 : index
      %c0_12 = arith.constant 0 : index
      %15 = vector.load %arg3[%c0_11, %c0_12] : memref<1x512xf32, #tpu.memory_space<vmem>>, vector<1x512xf32>
      %16 = vector.broadcast %15 : vector<1x512xf32> to vector<8x512xf32>
      %17 = arith.addf %14, %16 : vector<8x512xf32>
      %cst_13 = arith.constant 0.000000e+00 : f32
      %18 = vector.broadcast %cst_13 : f32 to vector<8x512xf32>
      %19 = arith.maximumf %17, %18 : vector<8x512xf32>
      %20 = arith.truncf %19 : vector<8x512xf32> to vector<8x512xbf16>
      %c0_14 = arith.constant 0 : index
      %c0_15 = arith.constant 0 : index
      %21 = vector.load %arg4[%c0_14, %c0_15] : memref<512x256xbf16, #tpu.memory_space<vmem>>, vector<512x256xbf16>
      %cst_16 = arith.constant dense<0.000000e+00> : vector<8x256xf32>
      %22 = tpu.matmul %20, %21, %cst_16 {dimension_numbers = #tpu.dot_dimension_numbers<[1], [0], [0], [1], [0, 0, 1, 1], [], []>} : vector<8x512xbf16>, vector<512x256xbf16>, vector<8x256xf32> -> vector<8x256xf32>
      %c0_17 = arith.constant 0 : index
      %c0_18 = arith.constant 0 : index
      %23 = vector.load %arg5[%c0_17, %c0_18] : memref<1x256xf32, #tpu.memory_space<vmem>>, vector<1x256xf32>
      %24 = vector.broadcast %23 : vector<1x256xf32> to vector<8x256xf32>
      %25 = arith.addf %22, %24 : vector<8x256xf32>
      %cst_19 = arith.constant 0.000000e+00 : f32
      %26 = vector.broadcast %cst_19 : f32 to vector<8x256xf32>
      %27 = arith.maximumf %25, %26 : vector<8x256xf32>
      %28 = arith.truncf %27 : vector<8x256xf32> to vector<8x256xbf16>
      %c0_20 = arith.constant 0 : index
      %c0_21 = arith.constant 0 : index
      %29 = vector.load %arg6[%c0_20, %c0_21] : memref<256x128xbf16, #tpu.memory_space<vmem>>, vector<256x128xbf16>
      %cst_22 = arith.constant dense<0.000000e+00> : vector<8x128xf32>
      %30 = tpu.matmul %28, %29, %cst_22 {dimension_numbers = #tpu.dot_dimension_numbers<[1], [0], [0], [1], [0, 0, 1, 1], [], []>} : vector<8x256xbf16>, vector<256x128xbf16>, vector<8x128xf32> -> vector<8x128xf32>
      %c0_23 = arith.constant 0 : index
      %c0_24 = arith.constant 0 : index
      %31 = vector.load %arg7[%c0_23, %c0_24] : memref<1x128xf32, #tpu.memory_space<vmem>>, vector<1x128xf32>
      %32 = vector.broadcast %31 : vector<1x128xf32> to vector<8x128xf32>
      %33 = arith.addf %30, %32 : vector<8x128xf32>
      %c0_25 = arith.constant 0 : index
      %c0_26 = arith.constant 0 : index
      %34 = vector.load %arg8[%c0_25, %c0_26] : memref<8x128xf32, #tpu.memory_space<vmem>>, vector<8x128xf32>
      tpu.vector_store %arg8[%c0_25, %c0_26], %33 {strides = array<i32>} : memref<8x128xf32, #tpu.memory_space<vmem>>, vector<8x128xf32>,
    } else {
    }
    return
  }
  func.func @transform_0(%arg0: i32) -> (i32, i32, i32) {
    %c0_i32 = arith.constant 0 : i32
    %c0_i32_0 = arith.constant 0 : i32
    %c0_i32_1 = arith.constant 0 : i32
    %c0_i32_2 = arith.constant 0 : i32
    return %c0_i32, %c0_i32_0, %c0_i32_1 : i32, i32, i32
  }
  func.func @transform_1(%arg0: i32) -> (i32, i32) {
    %c0_i32 = arith.constant 0 : i32
    %c0_i32_0 = arith.constant 0 : i32
    return %arg0, %c0_i32 : i32, i32
  }
  func.func @transform_2(%arg0: i32) -> (i32, i32) {
    %c0_i32 = arith.constant 0 : i32
    %c0_i32_0 = arith.constant 0 : i32
    %c0_i32_1 = arith.constant 0 : i32
    return %c0_i32, %c0_i32_0 : i32, i32
  }
  func.func @transform_3(%arg0: i32) -> (i32, i32) {
    %c0_i32 = arith.constant 0 : i32
    %c0_i32_0 = arith.constant 0 : i32
    %c0_i32_1 = arith.constant 0 : i32
    return %c0_i32, %c0_i32_0 : i32, i32
  }
  func.func @transform_4(%arg0: i32) -> (i32, i32) {
    %c0_i32 = arith.constant 0 : i32
    %c0_i32_0 = arith.constant 0 : i32
    %c0_i32_1 = arith.constant 0 : i32
    return %c0_i32, %c0_i32_0 : i32, i32
  }
  func.func @transform_5(%arg0: i32) -> (i32, i32) {
    %c0_i32 = arith.constant 0 : i32
    %c0_i32_0 = arith.constant 0 : i32
    %c0_i32_1 = arith.constant 0 : i32
    return %c0_i32, %c0_i32_0 : i32, i32
  }
  func.func @transform_6(%arg0: i32) -> (i32, i32) {
    %c0_i32 = arith.constant 0 : i32
    %c0_i32_0 = arith.constant 0 : i32
    %c0_i32_1 = arith.constant 0 : i32
    return %c0_i32, %c0_i32_0 : i32, i32
  }
  func.func @transform_7(%arg0: i32) -> (i32, i32) {
    %c0_i32 = arith.constant 0 : i32
    %c0_i32_0 = arith.constant 0 : i32
    %c0_i32_1 = arith.constant 0 : i32
    return %c0_i32, %c0_i32_0 : i32, i32
  }
}

</mosaic_0001>

<bundles_post_ra>
// kernel: tpu_custom_call.1
= control target key start
LH: loop header
LB: loop body
LE: loop exit
PB: predicated region body
PF: predicated region fallthrough
CT: control target
= control target key end

     0   :  { %12 = vsyncpa [#allocation4], 0  ;;  %s5090_s0 = inlined_call_operand.hbm [shape: bf16[3,8,1024], index: 0, kind: input, shape index: {}]   ;;  %s5091_s1 = inlined_call_operand.hbm [shape: bf16[3072,512], index: 1, kind: input, shape index: {}]   ;;  %s5092_s2 = inlined_call_operand.hbm [shape: f32[1,512], index: 2, kind: input, shape index: {}]   ;;  %s5093_s3 = inlined_call_operand.hbm [shape: bf16[512,256], index: 3, kind: input, shape index: {}]   ;;  %s5094_s4 = inlined_call_operand.hbm [shape: f32[1,256], index: 4, kind: input, shape index: {}]   ;;  %s5095_s5 = inlined_call_operand.hbm [shape: bf16[256,128], index: 5, kind: input, shape index: {}]   ;;  %s5096_s6 = inlined_call_operand.hbm [shape: f32[1,128], index: 6, kind: input, shape index: {}]   ;;  %s5097_s7 = inlined_call_operand.hbm [shape: f32[8,128], index: 7, kind: output, shape index: {}]  }
   0x1   :  { %13 = vsyncpa [#allocation7], 0 }
   0x2   :  { %15 = vsyncpa [#allocation7 + $0x1], 0 }
   0x3   :  { %16 = vsyncpa [#allocation10], 0 }
   0x4   :  { %17 = vsyncpa [#allocation13], 0 }
   0x5   :  { %18 = vsyncpa [#allocation5], 0  ;;  %s4466_s24 = smov 0   ;;  %s4468_s25 = smov 0  }
   0x6   :  { %s4470_s26 = smov 0   ;;  %s4472_s27 = smov 0  }
   0x7 LB: > { %s4409_s28 = smov [#allocation8]   ;;  %s4487_s30 = sadd.s32 4294967295, %s4407_s27   ;;  %s4407_s27 = sphi %s4472_s27, %s5119_s27   ;;  %s4403_s26 = sphi %s4470_s26, %s5118_s26   ;;  %s4399_s25 = sphi %s4468_s25, %s5117_s25   ;;  %s4395_s24 = sphi %s4466_s24, %s5116_s24  }
   0x8   : > { %s228_s29 = sshll.u32 %s4409_s28, 4  ;;  %p3107_p0 = scmp.ge.s32.totalorder %s4407_s27, 1  ;;  %s229_s29 = int_to_ptr.vmem [resolvable:$true] %s228_s29 }
   0x9   : > { %p5098_p1 = scmp.eq.s32.totalorder %s4487_s30, 0  ;;  %p202_p2 = scmp.lt.s32.totalorder %s4407_s27, 4 }
   0xa   : > { %s4410_s9 = smov [#allocation9]   ;;  %s4411_s12 = smov [#allocation12]  }
   0xb   : > { %p4493_p4 = pnand %p3107_p0, %p202_p2  ;;  %s238_s10 = sshll.u32 %s4410_s9, 4  ;;  %s4499_s10 = int_to_ptr.vmem [resolvable:$true] %s238_s10 }
   0xc   : > { %s262_s13 = sshll.u32 %s4411_s12, 4  ;;  %s4129_s16 = scalar_lea.hbm %s5092_s2, 64  ;;  %s4507_s13 = int_to_ptr.vmem [resolvable:$true] %s262_s13 }
   0xd   : > { %s5100_s8 = scalar_select %p4493_p4, 1, 0 }
   0xe   : > { %p3539_p5 = pneg %p4493_p4  ;;  %p4130_p7 = scmp.ne.s32.totalorder %s5092_s2, %s4129_s16 }
   0xf   : > { %p4136_p11 = scmp.lt.u32.totalorder %s4129_s16, %s5092_s2 }
  0x10   : > { %p4503_p6 = pnand %p3539_p5, %p5098_p1 }
  0x12   : > { %p4517_p8 = pneg %p4503_p6 }
  0x14   : > { %p4132_p9 = pnand %p4517_p8, %p4130_p7 }
  0x16   : > { %p4133_p10 = pneg %p4132_p9 }
  0x18   : > { %p4138_p12 = pnand %p4136_p11, %p4133_p10 }
  0x1a   : > { %4141 = shalt.err (!%p4138_p12)
}
  0x1b   : > { %s4142_s22 = scalar_lea.vmem %s229_s29, 64  ;;  %p4150_p5 = scmp.lt.s32.totalorder %s229_s29, %s229_s29 }
  0x1c   : > { %p4143_p13 = scmp.ne.s32.totalorder %s229_s29, %s4142_s22  ;;  %p4151_p3 = scmp.lt.s32.totalorder %s4142_s22, %s4142_s22 }
  0x1e   : > { %p4145_p0 = pnand %p4143_p13, %p4517_p8  ;;  %p4152_p1 = por %p4151_p3, %p4150_p5 }
  0x20   : > { %p4146_p2 = pneg %p4145_p0 }
  0x22   : > { %p4153_p4 = pnand %p4152_p1, %p4146_p2 }
  0x24   : > { %4156 = shalt.err (!%p4153_p4)
}
  0x25   : > { %3545 = dma.hbm_to_vmem [thread:$0]  (!%p4503_p6), %s5092_s2, 64, %s229_s29, [#allocation7]  }
  0x26   : > { %s4157_s14 = scalar_lea.hbm %s5093_s3, 8192 }
  0x27   : > { %p4158_p7 = scmp.ne.s32.totalorder %s5093_s3, %s4157_s14  ;;  %p4164_p1 = scmp.lt.u32.totalorder %s4157_s14, %s5093_s3 }
  0x29   : > { %p4160_p9 = pnand %p4158_p7, %p4517_p8 }
  0x2b   : > { %p4161_p3 = pneg %p4160_p9 }
  0x2d   : > { %p4166_p4 = pnand %p4164_p1, %p4161_p3 }
  0x2f   : > { %4169 = shalt.err (!%p4166_p4)
}
  0x30   : > { %s4170_s29 = scalar_lea.vmem %s4499_s10, 8192  ;;  %p4178_p13 = scmp.lt.s32.totalorder %s4499_s10, %s4499_s10 }
  0x31   : > { %p4171_p10 = scmp.ne.s32.totalorder %s4499_s10, %s4170_s29  ;;  %p4179_p0 = scmp.lt.s32.totalorder %s4170_s29, %s4170_s29 }
  0x33   : > { %p4173_p11 = pnand %p4171_p10, %p4517_p8  ;;  %p4180_p2 = por %p4179_p0, %p4178_p13 }
  0x35   : > { %p4174_p12 = pneg %p4173_p11 }
  0x37   : > { %p4181_p5 = pnand %p4180_p2, %p4174_p12 }
  0x39   : > { %4184 = shalt.err (!%p4181_p5)
}
  0x3a   : > { %s4412_s20 = smov 128   ;;  %s4413_s21 = smov 8  }
  0x3b   : > { %3548 = dma.hbm_to_vmem [thread:$0]  (!%p4503_p6), %s5093_s3, 8192, %s4499_s10, [#allocation10], %s4412_s20, %s4412_s20, %s4413_s21  }
  0x3c   : > { %s4185_s12 = scalar_lea.hbm %s5095_s5, 2048 }
  0x3d   : > { %p4186_p7 = scmp.ne.s32.totalorder %s5095_s5, %s4185_s12  ;;  %p4192_p1 = scmp.lt.u32.totalorder %s4185_s12, %s5095_s5 }
  0x3f   : > { %p4188_p9 = pnand %p4186_p7, %p4517_p8 }
  0x41   : > { %p4189_p3 = pneg %p4188_p9 }
  0x43   : > { %p4194_p4 = pnand %p4192_p1, %p4189_p3 }
  0x45   : > { %4197 = shalt.err (!%p4194_p4)
}
  0x46   : > { %s4198_s10 = scalar_lea.vmem %s4507_s13, 2048  ;;  %p4206_p13 = scmp.lt.s32.totalorder %s4507_s13, %s4507_s13 }
  0x47   : > { %p4199_p10 = scmp.ne.s32.totalorder %s4507_s13, %s4198_s10  ;;  %p4207_p0 = scmp.lt.s32.totalorder %s4198_s10, %s4198_s10 }
  0x49   : > { %p4201_p11 = pnand %p4199_p10, %p4517_p8  ;;  %p4208_p2 = por %p4207_p0, %p4206_p13 }
  0x4b   : > { %p4202_p12 = pneg %p4201_p11 }
  0x4d   : > { %p4209_p5 = pnand %p4208_p2, %p4202_p12 }
  0x4f   : > { %4212 = shalt.err (!%p4209_p5)
}
  0x50   : > { %s4414_s18 = smov 64   ;;  %s4415_s29 = smov 4  }
  0x51   : > { %3554 = dma.hbm_to_vmem [thread:$0]  (!%p4503_p6), %s5095_s5, 2048, %s4507_s13, [#allocation13], %s4414_s18, %s4414_s18, %s4415_s29  }
  0x52   : > { %s4416_s22 = smov [#allocation3]   ;;  %s4213_s12 = scalar_lea.hbm %s5090_s0, 1536 }
  0x53   : > { %s214_s23 = sshll.u32 %s4416_s22, 4  ;;  %p4214_p7 = scmp.ne.s32.totalorder %s5090_s0, %s4213_s12  ;;  %s215_s23 = int_to_ptr.vmem [resolvable:$true] %s214_s23 }
  0x54   : > { %p4220_p1 = scmp.lt.u32.totalorder %s4213_s12, %s5090_s0 }
  0x55   : > { %p4216_p9 = pnand %p4214_p7, %p4517_p8 }
  0x57   : > { %p4217_p3 = pneg %p4216_p9 }
  0x59   : > { %p4222_p4 = pnand %p4220_p1, %p4217_p3 }
  0x5b   : > { %4225 = shalt.err (!%p4222_p4)
}
  0x5c   : > { %s4226_s13 = scalar_lea.vmem %s215_s23, 1536  ;;  %p4234_p13 = scmp.lt.s32.totalorder %s215_s23, %s215_s23 }
  0x5d   : > { %p4227_p10 = scmp.ne.s32.totalorder %s215_s23, %s4226_s13  ;;  %p4235_p0 = scmp.lt.s32.totalorder %s4226_s13, %s4226_s13 }
  0x5f   : > { %p4229_p11 = pnand %p4227_p10, %p4517_p8  ;;  %p4236_p2 = por %p4235_p0, %p4234_p13 }
  0x61   : > { %p4230_p12 = pneg %p4229_p11 }
  0x63   : > { %p4237_p5 = pnand %p4236_p2, %p4230_p12 }
  0x65   : > { %4240 = shalt.err (!%p4237_p5)
}
  0x66   : > { %s4417_s10 = smov 512   ;;  %s4418_s18 = smov 32  }
  0x67   : > { %3542 = dma.hbm_to_vmem [thread:$0]  (!%p4503_p6), %s5090_s0, 1536, %s215_s23, [#allocation4], %s4417_s10, %s4417_s10, %s4418_s18  }
  0x68   : > { %s4419_s21 = smov [#allocation11]   ;;  %s4420_s28 = smov [#allocation14]  }
  0x69   : > { %s252_s22 = sshll.u32 %s4419_s21, 4  ;;  %s276_s9 = sshll.u32 %s4420_s28, 4  ;;  %s253_s22 = int_to_ptr.vmem [resolvable:$true] %s252_s22  ;;  %s4597_s9 = int_to_ptr.vmem [resolvable:$true] %s276_s9 }
  0x6a   : > { %s4241_s15 = scalar_lea.hbm %s5094_s4, 32 }
  0x6b   : > { %p4242_p7 = scmp.ne.s32.totalorder %s5094_s4, %s4241_s15  ;;  %p4248_p1 = scmp.lt.u32.totalorder %s4241_s15, %s5094_s4 }
  0x6d   : > { %p4244_p9 = pnand %p4242_p7, %p4517_p8 }
  0x6f   : > { %p4245_p3 = pneg %p4244_p9 }
  0x71   : > { %p4250_p4 = pnand %p4248_p1, %p4245_p3 }
  0x73   : > { %4253 = shalt.err (!%p4250_p4)
}
  0x74   : > { %s4254_s10 = scalar_lea.vmem %s253_s22, 32  ;;  %p4262_p13 = scmp.lt.s32.totalorder %s253_s22, %s253_s22 }
  0x75   : > { %p4255_p10 = scmp.ne.s32.totalorder %s253_s22, %s4254_s10  ;;  %p4263_p0 = scmp.lt.s32.totalorder %s4254_s10, %s4254_s10 }
  0x77   : > { %p4257_p11 = pnand %p4255_p10, %p4517_p8  ;;  %p4264_p2 = por %p4263_p0, %p4262_p13 }
  0x79   : > { %p4258_p12 = pneg %p4257_p11 }
  0x7b   : > { %p4265_p5 = pnand %p4264_p2, %p4258_p12 }
  0x7d   : > { %4268 = shalt.err (!%p4265_p5)
}
  0x7e   : > { %3551 = dma.hbm_to_vmem [thread:$0]  (!%p4503_p6), %s5094_s4, 32, %s253_s22, [#allocation10]  }
  0x7f   : > { %s4269_s28 = scalar_lea.hbm %s5096_s6, 16 }
  0x80   : > { %p4270_p7 = scmp.ne.s32.totalorder %s5096_s6, %s4269_s28  ;;  %p4276_p1 = scmp.lt.u32.totalorder %s4269_s28, %s5096_s6 }
  0x82   : > { %p4272_p9 = pnand %p4270_p7, %p4517_p8 }
  0x84   : > { %p4273_p3 = pneg %p4272_p9 }
  0x86   : > { %p4278_p4 = pnand %p4276_p1, %p4273_p3 }
  0x88   : > { %4281 = shalt.err (!%p4278_p4)
}
  0x89   : > { %s4282_s22 = scalar_lea.vmem %s4597_s9, 16  ;;  %s4289_s17 = scalar_lea.vmem %s4597_s9, 32 }
  0x8a   : > { %p4283_p10 = scmp.ne.s32.totalorder %s4597_s9, %s4282_s22  ;;  %p4290_p13 = scmp.lt.s32.totalorder %s4597_s9, %s4597_s9 }
  0x8b   : > { %p4291_p0 = scmp.lt.s32.totalorder %s4289_s17, %s4282_s22 }
  0x8c   : > { %p4285_p11 = pnand %p4283_p10, %p4517_p8 }
  0x8d   : > { %p4292_p2 = por %p4291_p0, %p4290_p13 }
  0x8e   : > { %p4286_p12 = pneg %p4285_p11 }
  0x90   : > { %p4293_p5 = pnand %p4292_p2, %p4286_p12 }
  0x92   : > { %4296 = shalt.err (!%p4293_p5)
}
  0x93   : > { %3557 = dma.hbm_to_vmem [thread:$0]  (!%p4503_p6), %s5096_s6, 16, %s4597_s9, [#allocation13]  }
  0x94   : > { %s4642_s11 = sadd.s32 1, %s4407_s27   ;;  %s52_s19 = sadd.s32 1, %s4403_s26 }
  0x95   : > { %s49_s10 = ssub.s32 %s4407_s27, %s4642_s11  ;;  %p59_p8 = scmp.ne.s32.totalorder %s4403_s26, %s4399_s25 }
  0x96   : > { %p50_p7 = scmp.eq.s32.totalorder %s49_s10, 0  ;;  %p60_p9 = scmp.eq.s32.totalorder %s4407_s27, 0 }
  0x97   : > { %p65_p3 = scmp.ne.s32.totalorder %s4399_s25, %s4395_s24  ;;  %p3568_p1 = scmp.lt.s32.totalorder %s4407_s27, 3 }
  0x98   : > { %s4654_s18 = scalar_select %p50_p7, %s4403_s26, %s52_s19  }
  0x99   : > { %p61_p4 = por %p60_p9, %p59_p8  ;;  %p5103_p10 = scmp.eq.s32.totalorder %s4487_s30, 0 }
  0x9a   : > { %s287_s20 = sand.u32 1, %s4407_s27   ;;  %s289_s9 = sand.u32 1, %s4403_s26  }
  0x9b   : > { %p4658_p11 = por %p5103_p10, %p65_p3  ;;  %s3115_s21 = sshll.u32 %s289_s9, 11 }
  0x9c   : > { %s3481_s28 = sshll.u32 %s4407_s27, 15  ;;  %s291_s24 = scalar_lea.vmem [#allocation6], %s3115_s21 }
  0x9d   : > { %s4668_s15 = scalar_lea.hbm %s5091_s1, %s3481_s28  ;;  %s299_s16 = sshll.u32 %s291_s24, 4  ;;  %s4670_s16 = int_to_ptr.vmem [resolvable:$true] %s299_s16 }
  0x9e   : > { %p4672_p6 = pnand %p3568_p1, %p61_p4  ;;  %s4676_s27 = scalar_lea.sflag [#allocation7], %s287_s20 }
  0x9f   : > { %s4297_s17 = scalar_lea.hbm %s4668_s15, 32768  ;;  %s4302_s19 = scalar_lea.hbm %s5091_s1, 98304 }
  0xa0   : > { %p4298_p12 = scmp.ne.s32.totalorder %s4668_s15, %s4297_s17  ;;  %p4299_p13 = pneg %p4672_p6 }
  0xa1   : > { %p4303_p5 = scmp.lt.u32.totalorder %s4668_s15, %s5091_s1  ;;  %p4304_p8 = scmp.lt.u32.totalorder %s4302_s19, %s4297_s17 }
  0xa2   : > { %p4300_p0 = pnand %p4299_p13, %p4298_p12  ;;  %p4306_p9 = scmp.lt.u32.totalorder %s4297_s17, %s4668_s15 }
  0xa3   : > { %p4305_p7 = por %p4304_p8, %p4303_p5 }
  0xa4   : > { %p4301_p2 = pneg %p4300_p0 }
  0xa5   : > { %p4307_p3 = por %p4306_p9, %p4305_p7 }
  0xa7   : > { %p4308_p1 = pnand %p4307_p3, %p4301_p2 }
  0xa9   : > { %4311 = shalt.err (!%p4308_p1)
}
  0xaa   : > { %s4312_s20 = scalar_lea.vmem %s4670_s16, 32768  ;;  %s4421_s21 = smov [#allocation6]  }
  0xab   : > { %p4313_p4 = scmp.ne.s32.totalorder %s4670_s16, %s4312_s20  ;;  %s4317_s28 = sshll.u32 %s4421_s21, 4  ;;  %s4318_s28 = int_to_ptr.vmem [resolvable:$false] %s4317_s28 }
  0xac   : > { %s4319_s12 = scalar_lea.vmem %s4318_s28, 65536  ;;  %p4320_p0 = scmp.lt.s32.totalorder %s4670_s16, %s4318_s28 }
  0xad   : > { %p4315_p10 = pnand %p4313_p4, %p4299_p13  ;;  %p4321_p5 = scmp.lt.s32.totalorder %s4319_s12, %s4312_s20 }
  0xaf   : > { %p4316_p12 = pneg %p4315_p10  ;;  %p4322_p8 = por %p4321_p5, %p4320_p0 }
  0xb1   : > { %p4323_p7 = pnand %p4322_p8, %p4316_p12 }
  0xb3   : > { %4326 = shalt.err (!%p4323_p7)
}
  0xb4   : > { %s4422_s14 = smov 256   ;;  %s4423_s24 = smov 16  }
  0xb5   : > { %3561 = dma.hbm_to_vmem [thread:$0]  (!%p4672_p6), %s4668_s15, 32768, %s4670_s16, %s4676_s27, %s4422_s14, %s4422_s14, %s4423_s24  }
  0xb6   : > { %p5106_p13 = scmp.ne.s32.totalorder %s5100_s8, 0 }
  0xb7   : > { %p5107_p2 = scmp.eq.s32.totalorder (!%p5106_p13), %s4487_s30, 0 }
  0xb8   : > { %311 = sbr.rel (%p5106_p13) target bundleno = 1174 (0x496), region = 48 }
  0xbf   : > { %4370 = dma.done.wait (%p5107_p2), [#allocation4], 1536   ;;  %p5108_p9 = pmov %p5107_p2 }
  0xc0   : > { %s317_s17 = sand.u32 1, %s4487_s30   ;;  %s319_s13 = sand.u32 1, %s4399_s25  }
  0xc1   : > { %4372 = vsyncadd (%p5108_p9), [#allocation4], 4294965760  ;;  %s3121_s23 = sshll.u32 %s319_s13, 11  ;;  %s318_s19 = scalar_lea.sflag [#allocation7], %s317_s17 }
  0xc2   : > { %s4712_s10 = scalar_lea.vmem [#allocation6], %s3121_s23 }
  0xc3   : > { %4374 = dma.done.wait (%p4658_p11), %s318_s19, 32768  }
  0xc4   : > { %4376 = vsyncadd (%p4658_p11), %s318_s19, 4294934528  ;;  %p5109_p6 = pmov %p5107_p2 }
  0xc5   : > { %p5110_p3 = pmov %p5107_p2 }
  0xc6   : > { %4378 = dma.done.wait (%p5109_p6), [#allocation7], 64  }
  0xc7   : > { %4380 = vsyncadd (%p5110_p3), [#allocation7], 4294967232  ;;  %p5111_p1 = pmov %p5107_p2 }
  0xc9   : > { %4382 = dma.done.wait (%p5111_p1), [#allocation10], 8224   ;;  %p5112_p4 = pmov %p5111_p1 }
  0xca   : > { %p5113_p10 = pmov %p5111_p1 }
  0xcb   : > { %4384 = vsyncadd (%p5112_p4), [#allocation10], 4294959072 }
  0xcc   : > { %4386 = dma.done.wait (%p5113_p10), [#allocation13], 2064   ;;  %p5114_p12 = pmov %p5111_p1 }
  0xcd   : > { %p5115_p11 = scmp.ne.s32.totalorder %s4487_s30, 0 }
  0xce   : > { %4388 = vsyncadd (%p5114_p12), [#allocation13], 4294965232  ;;  %v4424_v0 = vmov (!%p5115_p11), 0.0  }
  0xcf   : > { %372 = sbr.rel (%p5115_p11) target bundleno = 214 (0xd6), region = 80  ;;  %373 = vst [vmem:[#allocation2] sm:$0xff] (!%p5115_p11), %v4424_v0  ;;  %374 = vst [vmem:[#allocation2 + $0x8] sm:$0xff] (!%p5115_p11), %v4424_v0 }
  0xd0   : > { %375 = vst [vmem:[#allocation2 + $0x10] sm:$0xff] (!%p5115_p11), %v4424_v0  ;;  %376 = vst [vmem:[#allocation2 + $0x18] sm:$0xff] (!%p5115_p11), %v4424_v0 }
  0xd6 PF: > { %v3625_v1 = vld [vmem:[%s4712_s10 + $0x4] ss:$16 sps:$4 sm:$0xff]   ;;  %v3629_v3 = vld [vmem:[%s4712_s10] ss:$16 sps:$4 sm:$0xff]   ;;  %s3482_s8 = sshll.u32 %s4487_s30, 5  ;;  %p3394_p0 = scmp.ne.s32.totalorder %s4487_s30, 2 }
  0xd7   : > { %v3627_v2 = vld [vmem:[%s4712_s10 + $0x204] ss:$16 sps:$4 sm:$0xff]   ;;  %1952 = vmatprep.subr.bf16.mxu0 %v3625_v1  ;;  %v3630_v4 = vld [vmem:[%s4712_s10 + $0x200] ss:$16 sps:$4 sm:$0xff]   ;;  %s4779_s29 = scalar_lea.vmem [#allocation3], %s3482_s8 }
  0xd8   : > { %1993 = vmatprep.subr.bf16.mxu1 %v3627_v2  ;;  %v3631_v5 = vld [vmem:[%s4712_s10 + $0x24] ss:$16 sps:$4 sm:$0xff]   ;;  %1953 = vmatpush1.bf16.msra.mxu0 %v3629_v3  ;;  %v3635_v7 = vld [vmem:[%s4712_s10 + $0x20] ss:$16 sps:$4 sm:$0xff]   ;;  %v381_v49 = vld [vmem:[%s4779_s29 + $0x8] sm:$0xff] }
  0xd9   : > { %1994 = vmatpush1.bf16.msra.mxu1 %v3630_v4  ;;  %v3633_v6 = vld [vmem:[%s4712_s10 + $0x224] ss:$16 sps:$4 sm:$0xff]   ;;  %1954 = vmatprep.subr.bf16.mxu0 %v3631_v5  ;;  %v3636_v8 = vld [vmem:[%s4712_s10 + $0x220] ss:$16 sps:$4 sm:$0xff]   ;;  %v4787_v52 = vcombine.high %v381_v49, %v381_v49 }
  0xda   : > { %1995 = vmatprep.subr.bf16.mxu1 %v3633_v6  ;;  %v3637_v9 = vld [vmem:[%s4712_s10 + $0x44] ss:$16 sps:$4 sm:$0xff]   ;;  %v3641_v11 = vld [vmem:[%s4712_s10 + $0x40] ss:$16 sps:$4 sm:$0xff]  }
  0xdb   : > { %v3639_v10 = vld [vmem:[%s4712_s10 + $0x244] ss:$16 sps:$4 sm:$0xff]   ;;  %v3642_v12 = vld [vmem:[%s4712_s10 + $0x240] ss:$16 sps:$4 sm:$0xff]   ;;  %2025 = vmatprep.mubr.bf16.mxu1 %v4787_v52 }
  0xdc   : > { %1955 = vmatpush1.bf16.msra.mxu0 %v3635_v7  ;;  %v3643_v13 = vld [vmem:[%s4712_s10 + $0x64] ss:$16 sps:$4 sm:$0xff]   ;;  %v3647_v15 = vld [vmem:[%s4712_s10 + $0x60] ss:$16 sps:$4 sm:$0xff]  }
  0xdd   : > { %1996 = vmatpush1.bf16.msra.mxu1 %v3636_v8  ;;  %1956 = vmatprep.subr.bf16.mxu0 %v3637_v9  ;;  %v3645_v14 = vld [vmem:[%s4712_s10 + $0x264] ss:$16 sps:$4 sm:$0xff]   ;;  %v3648_v16 = vld [vmem:[%s4712_s10 + $0x260] ss:$16 sps:$4 sm:$0xff]   ;;  %v4811_v8 = vcombine.low %v381_v49, %v381_v49 }
  0xde   : > { %1997 = vmatprep.subr.bf16.mxu1 %v3639_v10  ;;  %v3649_v17 = vld [vmem:[%s4712_s10 + $0x84] ss:$16 sps:$4 sm:$0xff]   ;;  %v3653_v19 = vld [vmem:[%s4712_s10 + $0x80] ss:$16 sps:$4 sm:$0xff]  }
  0xdf   : > { %v3651_v18 = vld [vmem:[%s4712_s10 + $0x284] ss:$16 sps:$4 sm:$0xff]   ;;  %v3654_v20 = vld [vmem:[%s4712_s10 + $0x280] ss:$16 sps:$4 sm:$0xff]  }
  0xe0   : > { %1957 = vmatpush1.bf16.msra.mxu0 %v3641_v11  ;;  %v3655_v21 = vld [vmem:[%s4712_s10 + $0xa4] ss:$16 sps:$4 sm:$0xff]   ;;  %v3659_v23 = vld [vmem:[%s4712_s10 + $0xa0] ss:$16 sps:$4 sm:$0xff]  }
  0xe1   : > { %1998 = vmatpush1.bf16.msra.mxu1 %v3642_v12  ;;  %1958 = vmatprep.subr.bf16.mxu0 %v3643_v13  ;;  %v3657_v22 = vld [vmem:[%s4712_s10 + $0x2a4] ss:$16 sps:$4 sm:$0xff]   ;;  %v3660_v24 = vld [vmem:[%s4712_s10 + $0x2a0] ss:$16 sps:$4 sm:$0xff]  }
  0xe2   : > { %1999 = vmatprep.subr.bf16.mxu1 %v3645_v14  ;;  %v3661_v25 = vld [vmem:[%s4712_s10 + $0xc4] ss:$16 sps:$4 sm:$0xff]   ;;  %v3665_v27 = vld [vmem:[%s4712_s10 + $0xc0] ss:$16 sps:$4 sm:$0xff]  }
  0xe3   : > { %v3663_v26 = vld [vmem:[%s4712_s10 + $0x2c4] ss:$16 sps:$4 sm:$0xff]   ;;  %v3666_v28 = vld [vmem:[%s4712_s10 + $0x2c0] ss:$16 sps:$4 sm:$0xff]  }
  0xe4   : > { %1959 = vmatpush1.bf16.msra.mxu0 %v3647_v15  ;;  %v3667_v29 = vld [vmem:[%s4712_s10 + $0xe4] ss:$16 sps:$4 sm:$0xff]   ;;  %v3671_v31 = vld [vmem:[%s4712_s10 + $0xe0] ss:$16 sps:$4 sm:$0xff]  }
  0xe5   : > { %2000 = vmatpush1.bf16.msra.mxu1 %v3648_v16  ;;  %1960 = vmatprep.subr.bf16.mxu0 %v3649_v17  ;;  %v3669_v30 = vld [vmem:[%s4712_s10 + $0x2e4] ss:$16 sps:$4 sm:$0xff]   ;;  %v3672_v32 = vld [vmem:[%s4712_s10 + $0x2e0] ss:$16 sps:$4 sm:$0xff]  }
  0xe6   : > { %2001 = vmatprep.subr.bf16.mxu1 %v3651_v18  ;;  %v3673_v33 = vld [vmem:[%s4712_s10 + $0x104] ss:$16 sps:$4 sm:$0xff]   ;;  %v3677_v35 = vld [vmem:[%s4712_s10 + $0x100] ss:$16 sps:$4 sm:$0xff]  }
  0xe7   : > { %v3675_v34 = vld [vmem:[%s4712_s10 + $0x304] ss:$16 sps:$4 sm:$0xff]   ;;  %v3678_v36 = vld [vmem:[%s4712_s10 + $0x300] ss:$16 sps:$4 sm:$0xff]  }
  0xe8   : > { %1961 = vmatpush1.bf16.msra.mxu0 %v3653_v19  ;;  %v3679_v37 = vld [vmem:[%s4712_s10 + $0x124] ss:$16 sps:$4 sm:$0xff]   ;;  %v3683_v39 = vld [vmem:[%s4712_s10 + $0x120] ss:$16 sps:$4 sm:$0xff]  }
  0xe9   : > { %2002 = vmatpush1.bf16.msra.mxu1 %v3654_v20  ;;  %1962 = vmatprep.subr.bf16.mxu0 %v3655_v21  ;;  %v3681_v38 = vld [vmem:[%s4712_s10 + $0x324] ss:$16 sps:$4 sm:$0xff]   ;;  %v3684_v40 = vld [vmem:[%s4712_s10 + $0x320] ss:$16 sps:$4 sm:$0xff]  }
  0xea   : > { %2003 = vmatprep.subr.bf16.mxu1 %v3657_v22  ;;  %v3685_v41 = vld [vmem:[%s4712_s10 + $0x144] ss:$16 sps:$4 sm:$0xff]   ;;  %v3689_v43 = vld [vmem:[%s4712_s10 + $0x140] ss:$16 sps:$4 sm:$0xff]  }
  0xeb   : > { %v3687_v42 = vld [vmem:[%s4712_s10 + $0x344] ss:$16 sps:$4 sm:$0xff]   ;;  %v3690_v44 = vld [vmem:[%s4712_s10 + $0x340] ss:$16 sps:$4 sm:$0xff]  }
  0xec   : > { %1963 = vmatpush1.bf16.msra.mxu0 %v3659_v23  ;;  %v3691_v45 = vld [vmem:[%s4712_s10 + $0x164] ss:$16 sps:$4 sm:$0xff]   ;;  %v3695_v50 = vld [vmem:[%s4712_s10 + $0x160] ss:$16 sps:$4 sm:$0xff]  }
  0xed   : > { %2004 = vmatpush1.bf16.msra.mxu1 %v3660_v24  ;;  %1964 = vmatprep.subr.bf16.mxu0 %v3661_v25  ;;  %v3693_v46 = vld [vmem:[%s4712_s10 + $0x364] ss:$16 sps:$4 sm:$0xff]   ;;  %v3696_v51 = vld [vmem:[%s4712_s10 + $0x360] ss:$16 sps:$4 sm:$0xff]  }
  0xee   : > { %2005 = vmatprep.subr.bf16.mxu1 %v3663_v26  ;;  %v380_v47 = vld [vmem:[%s4779_s29] sm:$0xff] }
  0xef   : > { %v4782_v48 = vcombine.high %v380_v47, %v380_v47  ;;  %v3697_v53 = vld [vmem:[%s4712_s10 + $0x184] ss:$16 sps:$4 sm:$0xff]   ;;  %v3701_v55 = vld [vmem:[%s4712_s10 + $0x180] ss:$16 sps:$4 sm:$0xff]   ;;  %v4809_v7 = vcombine.low %v380_v47, %v380_v47 }
  0xf0   : > { %1965 = vmatpush1.bf16.msra.mxu0 %v3665_v27  ;;  %v3699_v54 = vld [vmem:[%s4712_s10 + $0x384] ss:$16 sps:$4 sm:$0xff]   ;;  %v3702_v56 = vld [vmem:[%s4712_s10 + $0x380] ss:$16 sps:$4 sm:$0xff]  }
  0xf1   : > { %2006 = vmatpush1.bf16.msra.mxu1 %v3666_v28  ;;  %1966 = vmatprep.subr.bf16.mxu0 %v3667_v29  ;;  %v3703_v57 = vld [vmem:[%s4712_s10 + $0x1a4] ss:$16 sps:$4 sm:$0xff]   ;;  %v3707_v59 = vld [vmem:[%s4712_s10 + $0x1a0] ss:$16 sps:$4 sm:$0xff]  }
  0xf2   : > { %2007 = vmatprep.subr.bf16.mxu1 %v3669_v30  ;;  %1984 = vmatprep.mubr.bf16.mxu0 %v4782_v48  ;;  %v3705_v58 = vld [vmem:[%s4712_s10 + $0x3a4] ss:$16 sps:$4 sm:$0xff]   ;;  %v3708_v60 = vld [vmem:[%s4712_s10 + $0x3a0] ss:$16 sps:$4 sm:$0xff]  }
  0xf3   : > { %v3709_v61 = vld [vmem:[%s4712_s10 + $0x1c4] ss:$16 sps:$4 sm:$0xff]   ;;  %v3713_v63 = vld [vmem:[%s4712_s10 + $0x1c0] ss:$16 sps:$4 sm:$0xff]  }
  0xf4   : > { %1967 = vmatpush1.bf16.msra.mxu0 %v3671_v31  ;;  %v3711_v62 = vld [vmem:[%s4712_s10 + $0x3c4] ss:$16 sps:$4 sm:$0xff]   ;;  %v3714_v0 = vld [vmem:[%s4712_s10 + $0x3c0] ss:$16 sps:$4 sm:$0xff]  }
  0xf5   : > { %2008 = vmatpush1.bf16.msra.mxu1 %v3672_v32  ;;  %1968 = vmatprep.subr.bf16.mxu0 %v3673_v33  ;;  %v3715_v1 = vld [vmem:[%s4712_s10 + $0x1e4] ss:$16 sps:$4 sm:$0xff]   ;;  %v3719_v3 = vld [vmem:[%s4712_s10 + $0x1e0] ss:$16 sps:$4 sm:$0xff]  }
  0xf6   : > { %2009 = vmatprep.subr.bf16.mxu1 %v3675_v34  ;;  %v3717_v2 = vld [vmem:[%s4712_s10 + $0x3e4] ss:$16 sps:$4 sm:$0xff]   ;;  %v3720_v4 = vld [vmem:[%s4712_s10 + $0x3e0] ss:$16 sps:$4 sm:$0xff]   ;;  %v4843_v34 = vld [vmem:[%s4779_s29 + $0x18] sm:$0xff] }
  0xf7   : > { %v3727_v5 = vld [vmem:[%s4712_s10 + $0x404] ss:$16 sps:$4 sm:$0xff]   ;;  %v3725_v9 = vld [vmem:[%s4712_s10 + $0x400] ss:$16 sps:$4 sm:$0xff]  }
  0xf8   : > { %1969 = vmatpush1.bf16.msra.mxu0 %v3677_v35  ;;  %v3730_v6 = vld [vmem:[%s4712_s10 + $0x604] ss:$16 sps:$4 sm:$0xff]   ;;  %v3728_v10 = vld [vmem:[%s4712_s10 + $0x600] ss:$16 sps:$4 sm:$0xff]  }
  0xf9   : > { %2010 = vmatpush1.bf16.msra.mxu1 %v3678_v36  ;;  %1970 = vmatprep.subr.bf16.mxu0 %v3679_v37  ;;  %v3733_v11 = vld [vmem:[%s4712_s10 + $0x424] ss:$16 sps:$4 sm:$0xff]   ;;  %v3731_v13 = vld [vmem:[%s4712_s10 + $0x420] ss:$16 sps:$4 sm:$0xff]  }
  0xfa   : > { %2011 = vmatprep.subr.bf16.mxu1 %v3681_v38  ;;  %v3736_v12 = vld [vmem:[%s4712_s10 + $0x624] ss:$16 sps:$4 sm:$0xff]   ;;  %v3734_v14 = vld [vmem:[%s4712_s10 + $0x620] ss:$16 sps:$4 sm:$0xff]   ;;  %v4853_v38 = vcombine.high %v4843_v34, %v4843_v34 }
  0xfb   : > { %v3739_v15 = vld [vmem:[%s4712_s10 + $0x444] ss:$16 sps:$4 sm:$0xff]   ;;  %v3737_v17 = vld [vmem:[%s4712_s10 + $0x440] ss:$16 sps:$4 sm:$0xff]  }
  0xfc   : > { %1971 = vmatpush1.bf16.msra.mxu0 %v3683_v39  ;;  %v3742_v16 = vld [vmem:[%s4712_s10 + $0x644] ss:$16 sps:$4 sm:$0xff]   ;;  %v3740_v18 = vld [vmem:[%s4712_s10 + $0x640] ss:$16 sps:$4 sm:$0xff]  }
  0xfd   : > { %2012 = vmatpush1.bf16.msra.mxu1 %v3684_v40  ;;  %1972 = vmatprep.subr.bf16.mxu0 %v3685_v41  ;;  %v3745_v19 = vld [vmem:[%s4712_s10 + $0x464] ss:$16 sps:$4 sm:$0xff]   ;;  %v3743_v21 = vld [vmem:[%s4712_s10 + $0x460] ss:$16 sps:$4 sm:$0xff]  }
  0xfe   : > { %2013 = vmatprep.subr.bf16.mxu1 %v3687_v42  ;;  %v3748_v20 = vld [vmem:[%s4712_s10 + $0x664] ss:$16 sps:$4 sm:$0xff]   ;;  %v3746_v22 = vld [vmem:[%s4712_s10 + $0x660] ss:$16 sps:$4 sm:$0xff]  }
  0xff   : > { %v3751_v23 = vld [vmem:[%s4712_s10 + $0x484] ss:$16 sps:$4 sm:$0xff]   ;;  %v3749_v25 = vld [vmem:[%s4712_s10 + $0x480] ss:$16 sps:$4 sm:$0xff]  }
 0x100   : > { %1973 = vmatpush1.bf16.msra.mxu0 %v3689_v43  ;;  %v3754_v24 = vld [vmem:[%s4712_s10 + $0x684] ss:$16 sps:$4 sm:$0xff]   ;;  %v3752_v26 = vld [vmem:[%s4712_s10 + $0x680] ss:$16 sps:$4 sm:$0xff]  }
 0x101   : > { %2014 = vmatpush1.bf16.msra.mxu1 %v3690_v44  ;;  %1974 = vmatprep.subr.bf16.mxu0 %v3691_v45  ;;  %v3757_v27 = vld [vmem:[%s4712_s10 + $0x4a4] ss:$16 sps:$4 sm:$0xff]   ;;  %v3755_v29 = vld [vmem:[%s4712_s10 + $0x4a0] ss:$16 sps:$4 sm:$0xff]  }
 0x102   : > { %2015 = vmatprep.subr.bf16.mxu1 %v3693_v46  ;;  %v3760_v28 = vld [vmem:[%s4712_s10 + $0x6a4] ss:$16 sps:$4 sm:$0xff]   ;;  %v3758_v30 = vld [vmem:[%s4712_s10 + $0x6a0] ss:$16 sps:$4 sm:$0xff]  }
 0x103   : > { %v3763_v31 = vld [vmem:[%s4712_s10 + $0x4c4] ss:$16 sps:$4 sm:$0xff]   ;;  %v3761_v35 = vld [vmem:[%s4712_s10 + $0x4c0] ss:$16 sps:$4 sm:$0xff]  }
 0x104   : > { %1975 = vmatpush1.bf16.msra.mxu0 %v3695_v50  ;;  %v3766_v32 = vld [vmem:[%s4712_s10 + $0x6c4] ss:$16 sps:$4 sm:$0xff]   ;;  %v3764_v36 = vld [vmem:[%s4712_s10 + $0x6c0] ss:$16 sps:$4 sm:$0xff]  }
 0x105   : > { %2016 = vmatpush1.bf16.msra.mxu1 %v3696_v51  ;;  %1976 = vmatprep.subr.bf16.mxu0 %v3697_v53  ;;  %v4840_v33 = vld [vmem:[%s4779_s29 + $0x10] sm:$0xff] }
 0x106   : > { %2017 = vmatprep.subr.bf16.mxu1 %v3699_v54  ;;  %v4849_v37 = vcombine.high %v4840_v33, %v4840_v33  ;;  %v3769_v39 = vld [vmem:[%s4712_s10 + $0x4e4] ss:$16 sps:$4 sm:$0xff]   ;;  %v3767_v41 = vld [vmem:[%s4712_s10 + $0x4e0] ss:$16 sps:$4 sm:$0xff]  }
 0x107   : > { %v3772_v40 = vld [vmem:[%s4712_s10 + $0x6e4] ss:$16 sps:$4 sm:$0xff]   ;;  %v3770_v42 = vld [vmem:[%s4712_s10 + $0x6e0] ss:$16 sps:$4 sm:$0xff]  }
 0x108   : > { %1977 = vmatpush1.bf16.msra.mxu0 %v3701_v55  ;;  %v3775_v43 = vld [vmem:[%s4712_s10 + $0x504] ss:$16 sps:$4 sm:$0xff]   ;;  %v3773_v45 = vld [vmem:[%s4712_s10 + $0x500] ss:$16 sps:$4 sm:$0xff]  }
 0x109   : > { %2018 = vmatpush1.bf16.msra.mxu1 %v3702_v56  ;;  %1978 = vmatprep.subr.bf16.mxu0 %v3703_v57  ;;  %v3778_v44 = vld [vmem:[%s4712_s10 + $0x704] ss:$16 sps:$4 sm:$0xff]   ;;  %v3776_v46 = vld [vmem:[%s4712_s10 + $0x700] ss:$16 sps:$4 sm:$0xff]  }
 0x10a   : > { %2019 = vmatprep.subr.bf16.mxu1 %v3705_v58  ;;  %v3781_v47 = vld [vmem:[%s4712_s10 + $0x524] ss:$16 sps:$4 sm:$0xff]   ;;  %v3779_v50 = vld [vmem:[%s4712_s10 + $0x520] ss:$16 sps:$4 sm:$0xff]  }
 0x10b   : > { %v3784_v49 = vld [vmem:[%s4712_s10 + $0x724] ss:$16 sps:$4 sm:$0xff]   ;;  %v3782_v51 = vld [vmem:[%s4712_s10 + $0x720] ss:$16 sps:$4 sm:$0xff]  }
 0x10c   : > { %1979 = vmatpush1.bf16.msra.mxu0 %v3707_v59  ;;  %v3787_v53 = vld [vmem:[%s4712_s10 + $0x544] ss:$16 sps:$4 sm:$0xff]   ;;  %v3785_v55 = vld [vmem:[%s4712_s10 + $0x540] ss:$16 sps:$4 sm:$0xff]  }
 0x10d   : > { %2020 = vmatpush1.bf16.msra.mxu1 %v3708_v60  ;;  %1980 = vmatprep.subr.bf16.mxu0 %v3709_v61  ;;  %v3790_v54 = vld [vmem:[%s4712_s10 + $0x744] ss:$16 sps:$4 sm:$0xff]   ;;  %v3788_v56 = vld [vmem:[%s4712_s10 + $0x740] ss:$16 sps:$4 sm:$0xff]  }
 0x10e   : > { %2021 = vmatprep.subr.bf16.mxu1 %v3711_v62  ;;  %v3793_v57 = vld [vmem:[%s4712_s10 + $0x564] ss:$16 sps:$4 sm:$0xff]   ;;  %v3791_v59 = vld [vmem:[%s4712_s10 + $0x560] ss:$16 sps:$4 sm:$0xff]  }
 0x10f   : > { %v3796_v58 = vld [vmem:[%s4712_s10 + $0x764] ss:$16 sps:$4 sm:$0xff]   ;;  %v3794_v60 = vld [vmem:[%s4712_s10 + $0x760] ss:$16 sps:$4 sm:$0xff]  }
 0x110   : > { %1981 = vmatpush1.bf16.msra.mxu0 %v3713_v63  ;;  %v3799_v61 = vld [vmem:[%s4712_s10 + $0x584] ss:$16 sps:$4 sm:$0xff]   ;;  %v3797_v63 = vld [vmem:[%s4712_s10 + $0x580] ss:$16 sps:$4 sm:$0xff]  }
 0x111   : > { %2022 = vmatpush1.bf16.msra.mxu1 %v3714_v0  ;;  %1982 = vmatprep.subr.bf16.mxu0 %v3715_v1  ;;  %v3802_v62 = vld [vmem:[%s4712_s10 + $0x784] ss:$16 sps:$4 sm:$0xff]   ;;  %v3800_v0 = vld [vmem:[%s4712_s10 + $0x780] ss:$16 sps:$4 sm:$0xff]  }
 0x112   : > { %2023 = vmatprep.subr.bf16.mxu1 %v3717_v2  ;;  %v3805_v1 = vld [vmem:[%s4712_s10 + $0x5a4] ss:$16 sps:$4 sm:$0xff]  }
 0x113   : > { %v3808_v2 = vld [vmem:[%s4712_s10 + $0x7a4] ss:$16 sps:$4 sm:$0xff]  }
 0x114   : > { %1983 = vmatpush1.bf16.msra.mxu0 %v3719_v3  ;;  %v3803_v3 = vld [vmem:[%s4712_s10 + $0x5a0] ss:$16 sps:$4 sm:$0xff]  }
 0x115   : > { %2024 = vmatpush1.bf16.msra.mxu1 %v3720_v4  ;;  %2034 = vmatprep.subr.bf16.mxu0 %v3727_v5  ;;  %v3806_v4 = vld [vmem:[%s4712_s10 + $0x7a0] ss:$16 sps:$4 sm:$0xff]   ;;  %v3811_v5 = vld [vmem:[%s4712_s10 + $0x5c4] ss:$16 sps:$4 sm:$0xff]  }
 0x116   : > { %2075 = vmatprep.subr.bf16.mxu1 %v3730_v6  ;;  %v3814_v6 = vld [vmem:[%s4712_s10 + $0x7c4] ss:$16 sps:$4 sm:$0xff]  }
 0x117   : > { %1985 = vmatmul.mubr.bf16.vlgmr.msra.gmra.mrb[0].mxu0 %v4809_v7 }
 0x118   : > { %2026 = vmatmul.mubr.bf16.vlgmr.msra.gmra.mrb[0].mxu1 %v4811_v8  ;;  %2035 = vmatpush1.bf16.msra.mxu0 %v3725_v9  ;;  %v3809_v9 = vld [vmem:[%s4712_s10 + $0x5c0] ss:$16 sps:$4 sm:$0xff]  }
 0x119   : > { %2076 = vmatpush1.bf16.msra.mxu1 %v3728_v10  ;;  %2036 = vmatprep.subr.bf16.mxu0 %v3733_v11  ;;  %v3812_v10 = vld [vmem:[%s4712_s10 + $0x7c0] ss:$16 sps:$4 sm:$0xff]   ;;  %v3817_v11 = vld [vmem:[%s4712_s10 + $0x5e4] ss:$16 sps:$4 sm:$0xff]  }
 0x11a   : > { %2077 = vmatprep.subr.bf16.mxu1 %v3736_v12  ;;  %2066 = vmatprep.mubr.bf16.mxu0 %v4849_v37  ;;  %v3820_v12 = vld [vmem:[%s4712_s10 + $0x7e4] ss:$16 sps:$4 sm:$0xff]  }
 0x11b   : > { %2107 = vmatprep.mubr.bf16.mxu1 %v4853_v38 }
 0x11c   : > { %2037 = vmatpush1.bf16.msra.mxu0 %v3731_v13  ;;  %v3815_v13 = vld [vmem:[%s4712_s10 + $0x5e0] ss:$16 sps:$4 sm:$0xff]  }
 0x11d   : > { %2078 = vmatpush1.bf16.msra.mxu1 %v3734_v14  ;;  %2038 = vmatprep.subr.bf16.mxu0 %v3739_v15  ;;  %v3818_v14 = vld [vmem:[%s4712_s10 + $0x7e0] ss:$16 sps:$4 sm:$0xff]   ;;  %v3827_v15 = vld [vmem:[%s4712_s10 + $0xc] ss:$16 sps:$4 sm:$0xff]  }
 0x11e   : > { %2079 = vmatprep.subr.bf16.mxu1 %v3742_v16  ;;  %v3830_v16 = vld [vmem:[%s4712_s10 + $0x20c] ss:$16 sps:$4 sm:$0xff]  }
 0x120   : > { %2039 = vmatpush1.bf16.msra.mxu0 %v3737_v17  ;;  %v4897_v17 = vcombine.low %v4840_v33, %v4840_v33  ;;  %v3849_v33 = vld [vmem:[%s4712_s10 + $0x88] ss:$16 sps:$4 sm:$0xff]  }
 0x121   : > { %2080 = vmatpush1.bf16.msra.mxu1 %v3740_v18  ;;  %2040 = vmatprep.subr.bf16.mxu0 %v3745_v19  ;;  %v4901_v18 = vcombine.low %v4843_v34, %v4843_v34  ;;  %v3825_v19 = vld [vmem:[%s4712_s10 + $0x8] ss:$16 sps:$4 sm:$0xff]  }
 0x122   : > { %2081 = vmatprep.subr.bf16.mxu1 %v3748_v20  ;;  %v3828_v20 = vld [vmem:[%s4712_s10 + $0x208] ss:$16 sps:$4 sm:$0xff]  }
 0x123   : > { %v3852_v34 = vld [vmem:[%s4712_s10 + $0x288] ss:$16 sps:$4 sm:$0xff]  }
 0x124   : > { %2041 = vmatpush1.bf16.msra.mxu0 %v3743_v21  ;;  %v3833_v21 = vld [vmem:[%s4712_s10 + $0x2c] ss:$16 sps:$4 sm:$0xff]  }
 0x125   : > { %2082 = vmatpush1.bf16.msra.mxu1 %v3746_v22  ;;  %2042 = vmatprep.subr.bf16.mxu0 %v3751_v23  ;;  %v3836_v22 = vld [vmem:[%s4712_s10 + $0x22c] ss:$16 sps:$4 sm:$0xff]   ;;  %v3831_v23 = vld [vmem:[%s4712_s10 + $0x28] ss:$16 sps:$4 sm:$0xff]  }
 0x126   : > { %2083 = vmatprep.subr.bf16.mxu1 %v3754_v24  ;;  %v3834_v24 = vld [vmem:[%s4712_s10 + $0x228] ss:$16 sps:$4 sm:$0xff]  }
 0x128   : > { %2043 = vmatpush1.bf16.msra.mxu0 %v3749_v25  ;;  %v3839_v25 = vld [vmem:[%s4712_s10 + $0x4c] ss:$16 sps:$4 sm:$0xff]  }
 0x129   : > { %2084 = vmatpush1.bf16.msra.mxu1 %v3752_v26  ;;  %2044 = vmatprep.subr.bf16.mxu0 %v3757_v27  ;;  %v3842_v26 = vld [vmem:[%s4712_s10 + $0x24c] ss:$16 sps:$4 sm:$0xff]   ;;  %v3837_v27 = vld [vmem:[%s4712_s10 + $0x48] ss:$16 sps:$4 sm:$0xff]  }
 0x12a   : > { %2085 = vmatprep.subr.bf16.mxu1 %v3760_v28  ;;  %v3840_v28 = vld [vmem:[%s4712_s10 + $0x248] ss:$16 sps:$4 sm:$0xff]  }
 0x12c   : > { %2045 = vmatpush1.bf16.msra.mxu0 %v3755_v29  ;;  %v3845_v29 = vld [vmem:[%s4712_s10 + $0x6c] ss:$16 sps:$4 sm:$0xff]  }
 0x12d   : > { %2086 = vmatpush1.bf16.msra.mxu1 %v3758_v30  ;;  %2046 = vmatprep.subr.bf16.mxu0 %v3763_v31  ;;  %v3848_v30 = vld [vmem:[%s4712_s10 + $0x26c] ss:$16 sps:$4 sm:$0xff]   ;;  %v3843_v31 = vld [vmem:[%s4712_s10 + $0x68] ss:$16 sps:$4 sm:$0xff]  }
 0x12e   : > { %2087 = vmatprep.subr.bf16.mxu1 %v3766_v32  ;;  %v3846_v32 = vld [vmem:[%s4712_s10 + $0x268] ss:$16 sps:$4 sm:$0xff]  }
 0x130   : > { %2047 = vmatpush1.bf16.msra.mxu0 %v3761_v35  ;;  %v3857_v35 = vld [vmem:[%s4712_s10 + $0xac] ss:$16 sps:$4 sm:$0xff]  }
 0x131   : > { %2088 = vmatpush1.bf16.msra.mxu1 %v3764_v36  ;;  %2048 = vmatprep.subr.bf16.mxu0 %v3769_v39  ;;  %v3860_v36 = vld [vmem:[%s4712_s10 + $0x2ac] ss:$16 sps:$4 sm:$0xff]   ;;  %v3855_v39 = vld [vmem:[%s4712_s10 + $0xa8] ss:$16 sps:$4 sm:$0xff]  }
 0x132   : > { %2089 = vmatprep.subr.bf16.mxu1 %v3772_v40  ;;  %v3858_v40 = vld [vmem:[%s4712_s10 + $0x2a8] ss:$16 sps:$4 sm:$0xff]  }
 0x134   : > { %2049 = vmatpush1.bf16.msra.mxu0 %v3767_v41  ;;  %v3863_v41 = vld [vmem:[%s4712_s10 + $0xcc] ss:$16 sps:$4 sm:$0xff]  }
 0x135   : > { %2090 = vmatpush1.bf16.msra.mxu1 %v3770_v42  ;;  %2050 = vmatprep.subr.bf16.mxu0 %v3775_v43  ;;  %v3866_v42 = vld [vmem:[%s4712_s10 + $0x2cc] ss:$16 sps:$4 sm:$0xff]   ;;  %v3861_v43 = vld [vmem:[%s4712_s10 + $0xc8] ss:$16 sps:$4 sm:$0xff]  }
 0x136   : > { %2091 = vmatprep.subr.bf16.mxu1 %v3778_v44  ;;  %v3864_v44 = vld [vmem:[%s4712_s10 + $0x2c8] ss:$16 sps:$4 sm:$0xff]  }
 0x138   : > { %2051 = vmatpush1.bf16.msra.mxu0 %v3773_v45  ;;  %v3869_v45 = vld [vmem:[%s4712_s10 + $0xec] ss:$16 sps:$4 sm:$0xff]  }
 0x139   : > { %2092 = vmatpush1.bf16.msra.mxu1 %v3776_v46  ;;  %2052 = vmatprep.subr.bf16.mxu0 %v3781_v47  ;;  %v3872_v46 = vld [vmem:[%s4712_s10 + $0x2ec] ss:$16 sps:$4 sm:$0xff]   ;;  %v3867_v47 = vld [vmem:[%s4712_s10 + $0xe8] ss:$16 sps:$4 sm:$0xff]  }
 0x13a   : > { %2093 = vmatprep.subr.bf16.mxu1 %v3784_v49  ;;  %v3870_v49 = vld [vmem:[%s4712_s10 + $0x2e8] ss:$16 sps:$4 sm:$0xff]  }
 0x13c   : > { %2053 = vmatpush1.bf16.msra.mxu0 %v3779_v50  ;;  %v3875_v50 = vld [vmem:[%s4712_s10 + $0x10c] ss:$16 sps:$4 sm:$0xff]  }
 0x13d   : > { %2094 = vmatpush1.bf16.msra.mxu1 %v3782_v51  ;;  %2054 = vmatprep.subr.bf16.mxu0 %v3787_v53  ;;  %v3878_v51 = vld [vmem:[%s4712_s10 + $0x30c] ss:$16 sps:$4 sm:$0xff]   ;;  %v3873_v53 = vld [vmem:[%s4712_s10 + $0x108] ss:$16 sps:$4 sm:$0xff]  }
 0x13e   : > { %2095 = vmatprep.subr.bf16.mxu1 %v3790_v54  ;;  %v3876_v54 = vld [vmem:[%s4712_s10 + $0x308] ss:$16 sps:$4 sm:$0xff]  }
 0x140   : > { %2055 = vmatpush1.bf16.msra.mxu0 %v3785_v55  ;;  %v3881_v55 = vld [vmem:[%s4712_s10 + $0x12c] ss:$16 sps:$4 sm:$0xff]  }
 0x141   : > { %2096 = vmatpush1.bf16.msra.mxu1 %v3788_v56  ;;  %2056 = vmatprep.subr.bf16.mxu0 %v3793_v57  ;;  %v3884_v56 = vld [vmem:[%s4712_s10 + $0x32c] ss:$16 sps:$4 sm:$0xff]   ;;  %v3879_v57 = vld [vmem:[%s4712_s10 + $0x128] ss:$16 sps:$4 sm:$0xff]  }
 0x142   : > { %2097 = vmatprep.subr.bf16.mxu1 %v3796_v58  ;;  %v3882_v58 = vld [vmem:[%s4712_s10 + $0x328] ss:$16 sps:$4 sm:$0xff]  }
 0x144   : > { %2057 = vmatpush1.bf16.msra.mxu0 %v3791_v59  ;;  %v3887_v59 = vld [vmem:[%s4712_s10 + $0x14c] ss:$16 sps:$4 sm:$0xff]  }
 0x145   : > { %2098 = vmatpush1.bf16.msra.mxu1 %v3794_v60  ;;  %2058 = vmatprep.subr.bf16.mxu0 %v3799_v61  ;;  %v3890_v60 = vld [vmem:[%s4712_s10 + $0x34c] ss:$16 sps:$4 sm:$0xff]   ;;  %v3885_v61 = vld [vmem:[%s4712_s10 + $0x148] ss:$16 sps:$4 sm:$0xff]  }
 0x146   : > { %2099 = vmatprep.subr.bf16.mxu1 %v3802_v62  ;;  %v3888_v62 = vld [vmem:[%s4712_s10 + $0x348] ss:$16 sps:$4 sm:$0xff]  }
 0x148   : > { %2059 = vmatpush1.bf16.msra.mxu0 %v3797_v63  ;;  %v3893_v63 = vld [vmem:[%s4712_s10 + $0x16c] ss:$16 sps:$4 sm:$0xff]  }
 0x149   : > { %2100 = vmatpush1.bf16.msra.mxu1 %v3800_v0  ;;  %2060 = vmatprep.subr.bf16.mxu0 %v3805_v1  ;;  %v3896_v0 = vld [vmem:[%s4712_s10 + $0x36c] ss:$16 sps:$4 sm:$0xff]   ;;  %v3891_v1 = vld [vmem:[%s4712_s10 + $0x168] ss:$16 sps:$4 sm:$0xff]  }
 0x14a   : > { %2101 = vmatprep.subr.bf16.mxu1 %v3808_v2  ;;  %v3894_v2 = vld [vmem:[%s4712_s10 + $0x368] ss:$16 sps:$4 sm:$0xff]  }
 0x14c   : > { %2061 = vmatpush1.bf16.msra.mxu0 %v3803_v3  ;;  %v3899_v3 = vld [vmem:[%s4712_s10 + $0x18c] ss:$16 sps:$4 sm:$0xff]  }
 0x14d   : > { %2102 = vmatpush1.bf16.msra.mxu1 %v3806_v4  ;;  %2062 = vmatprep.subr.bf16.mxu0 %v3811_v5  ;;  %v3902_v4 = vld [vmem:[%s4712_s10 + $0x38c] ss:$16 sps:$4 sm:$0xff]   ;;  %v3897_v5 = vld [vmem:[%s4712_s10 + $0x188] ss:$16 sps:$4 sm:$0xff]  }
 0x14e   : > { %2103 = vmatprep.subr.bf16.mxu1 %v3814_v6  ;;  %v3900_v6 = vld [vmem:[%s4712_s10 + $0x388] ss:$16 sps:$4 sm:$0xff]  }
 0x150   : > { %2063 = vmatpush1.bf16.msra.mxu0 %v3809_v9  ;;  %v3905_v9 = vld [vmem:[%s4712_s10 + $0x1ac] ss:$16 sps:$4 sm:$0xff]  }
 0x151   : > { %2104 = vmatpush1.bf16.msra.mxu1 %v3812_v10  ;;  %2064 = vmatprep.subr.bf16.mxu0 %v3817_v11  ;;  %v3908_v10 = vld [vmem:[%s4712_s10 + $0x3ac] ss:$16 sps:$4 sm:$0xff]   ;;  %v3903_v11 = vld [vmem:[%s4712_s10 + $0x1a8] ss:$16 sps:$4 sm:$0xff]  }
 0x152   : > { %2105 = vmatprep.subr.bf16.mxu1 %v3820_v12  ;;  %v3906_v12 = vld [vmem:[%s4712_s10 + $0x3a8] ss:$16 sps:$4 sm:$0xff]  }
 0x154   : > { %2065 = vmatpush1.bf16.msra.mxu0 %v3815_v13  ;;  %v3911_v13 = vld [vmem:[%s4712_s10 + $0x1cc] ss:$16 sps:$4 sm:$0xff]  }
 0x155   : > { %2106 = vmatpush1.bf16.msra.mxu1 %v3818_v14  ;;  %2116 = vmatprep.subr.bf16.mxu0 %v3827_v15  ;;  %v3914_v14 = vld [vmem:[%s4712_s10 + $0x3cc] ss:$16 sps:$4 sm:$0xff]   ;;  %v3909_v15 = vld [vmem:[%s4712_s10 + $0x1c8] ss:$16 sps:$4 sm:$0xff]  }
 0x156   : > { %2157 = vmatprep.subr.bf16.mxu1 %v3830_v16  ;;  %v3912_v16 = vld [vmem:[%s4712_s10 + $0x3c8] ss:$16 sps:$4 sm:$0xff]  }
 0x157   : > { %2067 = vmatmul.mubr.bf16.vlgmr.msra.gmra.mrb[4].mxu0 %v4897_v17 }
 0x158   : > { %2108 = vmatmul.mubr.bf16.vlgmr.msra.gmra.mrb[4].mxu1 %v4901_v18  ;;  %2117 = vmatpush1.bf16.msra.mxu0 %v3825_v19  ;;  %v3917_v19 = vld [vmem:[%s4712_s10 + $0x1ec] ss:$16 sps:$4 sm:$0xff]  }
 0x159   : > { %2158 = vmatpush1.bf16.msra.mxu1 %v3828_v20  ;;  %2118 = vmatprep.subr.bf16.mxu0 %v3833_v21  ;;  %v3920_v20 = vld [vmem:[%s4712_s10 + $0x3ec] ss:$16 sps:$4 sm:$0xff]   ;;  %v3915_v21 = vld [vmem:[%s4712_s10 + $0x1e8] ss:$16 sps:$4 sm:$0xff]  }
 0x15a   : > { %2159 = vmatprep.subr.bf16.mxu1 %v3836_v22  ;;  %2148 = vmatprep.mubr.bf16.mxu0 %v4782_v48  ;;  %v3851_v48 = vld [vmem:[%s4712_s10 + $0x8c] ss:$16 sps:$4 sm:$0xff]   ;;  %v3918_v22 = vld [vmem:[%s4712_s10 + $0x3e8] ss:$16 sps:$4 sm:$0xff]  }
 0x15b   : > { %2189 = vmatprep.mubr.bf16.mxu1 %v4787_v52  ;;  %v3854_v52 = vld [vmem:[%s4712_s10 + $0x28c] ss:$16 sps:$4 sm:$0xff]  }
 0x15c   : > { %2119 = vmatpush1.bf16.msra.mxu0 %v3831_v23  ;;  %v3923_v23 = vld [vmem:[%s4712_s10 + $0x40c] ss:$16 sps:$4 sm:$0xff]  }
 0x15d   : > { %2160 = vmatpush1.bf16.msra.mxu1 %v3834_v24  ;;  %2120 = vmatprep.subr.bf16.mxu0 %v3839_v25  ;;  %v3926_v24 = vld [vmem:[%s4712_s10 + $0x60c] ss:$16 sps:$4 sm:$0xff]   ;;  %v3921_v25 = vld [vmem:[%s4712_s10 + $0x408] ss:$16 sps:$4 sm:$0xff]  }
 0x15e   : > { %2161 = vmatprep.subr.bf16.mxu1 %v3842_v26  ;;  %v3924_v26 = vld [vmem:[%s4712_s10 + $0x608] ss:$16 sps:$4 sm:$0xff]  }
 0x160   : > { %2121 = vmatpush1.bf16.msra.mxu0 %v3837_v27  ;;  %v3929_v27 = vld [vmem:[%s4712_s10 + $0x42c] ss:$16 sps:$4 sm:$0xff]  }
 0x161   : > { %2162 = vmatpush1.bf16.msra.mxu1 %v3840_v28  ;;  %2122 = vmatprep.subr.bf16.mxu0 %v3845_v29  ;;  %v3932_v28 = vld [vmem:[%s4712_s10 + $0x62c] ss:$16 sps:$4 sm:$0xff]   ;;  %v3927_v29 = vld [vmem:[%s4712_s10 + $0x428] ss:$16 sps:$4 sm:$0xff]  }
 0x162   : > { %2163 = vmatprep.subr.bf16.mxu1 %v3848_v30  ;;  %v3930_v30 = vld [vmem:[%s4712_s10 + $0x628] ss:$16 sps:$4 sm:$0xff]  }
 0x164   : > { %2123 = vmatpush1.bf16.msra.mxu0 %v3843_v31  ;;  %v3935_v31 = vld [vmem:[%s4712_s10 + $0x44c] ss:$16 sps:$4 sm:$0xff]  }
 0x165   : > { %2164 = vmatpush1.bf16.msra.mxu1 %v3846_v32  ;;  %2124 = vmatprep.subr.bf16.mxu0 %v3851_v48  ;;  %v3938_v32 = vld [vmem:[%s4712_s10 + $0x64c] ss:$16 sps:$4 sm:$0xff]  }
 0x166   : > { %2165 = vmatprep.subr.bf16.mxu1 %v3854_v52  ;;  %v3941_v48 = vld [vmem:[%s4712_s10 + $0x46c] ss:$16 sps:$4 sm:$0xff]  }
 0x167   : > { %v3944_v52 = vld [vmem:[%s4712_s10 + $0x66c] ss:$16 sps:$4 sm:$0xff]  }
 0x168   : > { %2125 = vmatpush1.bf16.msra.mxu0 %v3849_v33  ;;  %v3939_v33 = vld [vmem:[%s4712_s10 + $0x468] ss:$16 sps:$4 sm:$0xff]  }
 0x169   : > { %2166 = vmatpush1.bf16.msra.mxu1 %v3852_v34  ;;  %2126 = vmatprep.subr.bf16.mxu0 %v3857_v35  ;;  %v3950_v34 = vld [vmem:[%s4712_s10 + $0x68c] ss:$16 sps:$4 sm:$0xff]   ;;  %v3945_v35 = vld [vmem:[%s4712_s10 + $0x488] ss:$16 sps:$4 sm:$0xff]  }
 0x16a   : > { %2167 = vmatprep.subr.bf16.mxu1 %v3860_v36  ;;  %v3948_v36 = vld [vmem:[%s4712_s10 + $0x688] ss:$16 sps:$4 sm:$0xff]  }
 0x16c   : > { %2127 = vmatpush1.bf16.msra.mxu0 %v3855_v39  ;;  %v3953_v39 = vld [vmem:[%s4712_s10 + $0x4ac] ss:$16 sps:$4 sm:$0xff]  }
 0x16d   : > { %2168 = vmatpush1.bf16.msra.mxu1 %v3858_v40  ;;  %2128 = vmatprep.subr.bf16.mxu0 %v3863_v41  ;;  %v3956_v40 = vld [vmem:[%s4712_s10 + $0x6ac] ss:$16 sps:$4 sm:$0xff]   ;;  %v3951_v41 = vld [vmem:[%s4712_s10 + $0x4a8] ss:$16 sps:$4 sm:$0xff]  }
 0x16e   : > { %2169 = vmatprep.subr.bf16.mxu1 %v3866_v42  ;;  %v3954_v42 = vld [vmem:[%s4712_s10 + $0x6a8] ss:$16 sps:$4 sm:$0xff]  }
 0x170   : > { %2129 = vmatpush1.bf16.msra.mxu0 %v3861_v43  ;;  %v3959_v43 = vld [vmem:[%s4712_s10 + $0x4cc] ss:$16 sps:$4 sm:$0xff]  }
 0x171   : > { %2170 = vmatpush1.bf16.msra.mxu1 %v3864_v44  ;;  %2130 = vmatprep.subr.bf16.mxu0 %v3869_v45  ;;  %v3962_v44 = vld [vmem:[%s4712_s10 + $0x6cc] ss:$16 sps:$4 sm:$0xff]   ;;  %v3957_v45 = vld [vmem:[%s4712_s10 + $0x4c8] ss:$16 sps:$4 sm:$0xff]  }
 0x172   : > { %2171 = vmatprep.subr.bf16.mxu1 %v3872_v46  ;;  %v3960_v46 = vld [vmem:[%s4712_s10 + $0x6c8] ss:$16 sps:$4 sm:$0xff]  }
 0x174   : > { %2131 = vmatpush1.bf16.msra.mxu0 %v3867_v47  ;;  %v3965_v47 = vld [vmem:[%s4712_s10 + $0x4ec] ss:$16 sps:$4 sm:$0xff]  }
 0x175   : > { %2172 = vmatpush1.bf16.msra.mxu1 %v3870_v49  ;;  %2132 = vmatprep.subr.bf16.mxu0 %v3875_v50  ;;  %v3968_v49 = vld [vmem:[%s4712_s10 + $0x6ec] ss:$16 sps:$4 sm:$0xff]   ;;  %v3963_v50 = vld [vmem:[%s4712_s10 + $0x4e8] ss:$16 sps:$4 sm:$0xff]  }
 0x176   : > { %2173 = vmatprep.subr.bf16.mxu1 %v3878_v51  ;;  %v3966_v51 = vld [vmem:[%s4712_s10 + $0x6e8] ss:$16 sps:$4 sm:$0xff]  }
 0x178   : > { %2133 = vmatpush1.bf16.msra.mxu0 %v3873_v53  ;;  %v3971_v53 = vld [vmem:[%s4712_s10 + $0x50c] ss:$16 sps:$4 sm:$0xff]  }
 0x179   : > { %2174 = vmatpush1.bf16.msra.mxu1 %v3876_v54  ;;  %2134 = vmatprep.subr.bf16.mxu0 %v3881_v55  ;;  %v3974_v54 = vld [vmem:[%s4712_s10 + $0x70c] ss:$16 sps:$4 sm:$0xff]   ;;  %v3969_v55 = vld [vmem:[%s4712_s10 + $0x508] ss:$16 sps:$4 sm:$0xff]  }
 0x17a   : > { %2175 = vmatprep.subr.bf16.mxu1 %v3884_v56  ;;  %v3972_v56 = vld [vmem:[%s4712_s10 + $0x708] ss:$16 sps:$4 sm:$0xff]  }
 0x17c   : > { %2135 = vmatpush1.bf16.msra.mxu0 %v3879_v57  ;;  %v3977_v57 = vld [vmem:[%s4712_s10 + $0x52c] ss:$16 sps:$4 sm:$0xff]  }
 0x17d   : > { %2176 = vmatpush1.bf16.msra.mxu1 %v3882_v58  ;;  %2136 = vmatprep.subr.bf16.mxu0 %v3887_v59  ;;  %v3980_v58 = vld [vmem:[%s4712_s10 + $0x72c] ss:$16 sps:$4 sm:$0xff]   ;;  %v3975_v59 = vld [vmem:[%s4712_s10 + $0x528] ss:$16 sps:$4 sm:$0xff]  }
 0x17e   : > { %2177 = vmatprep.subr.bf16.mxu1 %v3890_v60  ;;  %v3978_v60 = vld [vmem:[%s4712_s10 + $0x728] ss:$16 sps:$4 sm:$0xff]  }
 0x180   : > { %2137 = vmatpush1.bf16.msra.mxu0 %v3885_v61  ;;  %v3983_v61 = vld [vmem:[%s4712_s10 + $0x54c] ss:$16 sps:$4 sm:$0xff]  }
 0x181   : > { %2178 = vmatpush1.bf16.msra.mxu1 %v3888_v62  ;;  %2138 = vmatprep.subr.bf16.mxu0 %v3893_v63  ;;  %v3986_v62 = vld [vmem:[%s4712_s10 + $0x74c] ss:$16 sps:$4 sm:$0xff]   ;;  %v3981_v63 = vld [vmem:[%s4712_s10 + $0x548] ss:$16 sps:$4 sm:$0xff]  }
 0x182   : > { %2179 = vmatprep.subr.bf16.mxu1 %v3896_v0  ;;  %v3984_v0 = vld [vmem:[%s4712_s10 + $0x748] ss:$16 sps:$4 sm:$0xff]  }
 0x184   : > { %2139 = vmatpush1.bf16.msra.mxu0 %v3891_v1  ;;  %v3989_v1 = vld [vmem:[%s4712_s10 + $0x56c] ss:$16 sps:$4 sm:$0xff]  }
 0x185   : > { %2180 = vmatpush1.bf16.msra.mxu1 %v3894_v2  ;;  %2140 = vmatprep.subr.bf16.mxu0 %v3899_v3  ;;  %v3992_v2 = vld [vmem:[%s4712_s10 + $0x76c] ss:$16 sps:$4 sm:$0xff]   ;;  %v3987_v3 = vld [vmem:[%s4712_s10 + $0x568] ss:$16 sps:$4 sm:$0xff]  }
 0x186   : > { %2181 = vmatprep.subr.bf16.mxu1 %v3902_v4  ;;  %v3990_v4 = vld [vmem:[%s4712_s10 + $0x768] ss:$16 sps:$4 sm:$0xff]  }
 0x188   : > { %2141 = vmatpush1.bf16.msra.mxu0 %v3897_v5  ;;  %v3995_v5 = vld [vmem:[%s4712_s10 + $0x58c] ss:$16 sps:$4 sm:$0xff]  }
 0x189   : > { %2182 = vmatpush1.bf16.msra.mxu1 %v3900_v6  ;;  %2142 = vmatprep.subr.bf16.mxu0 %v3905_v9  ;;  %v3998_v6 = vld [vmem:[%s4712_s10 + $0x78c] ss:$16 sps:$4 sm:$0xff]   ;;  %v3993_v9 = vld [vmem:[%s4712_s10 + $0x588] ss:$16 sps:$4 sm:$0xff]  }
 0x18a   : > { %2183 = vmatprep.subr.bf16.mxu1 %v3908_v10  ;;  %v3996_v10 = vld [vmem:[%s4712_s10 + $0x788] ss:$16 sps:$4 sm:$0xff]  }
 0x18c   : > { %2143 = vmatpush1.bf16.msra.mxu0 %v3903_v11  ;;  %v4001_v11 = vld [vmem:[%s4712_s10 + $0x5ac] ss:$16 sps:$4 sm:$0xff]  }
 0x18d   : > { %2184 = vmatpush1.bf16.msra.mxu1 %v3906_v12  ;;  %2144 = vmatprep.subr.bf16.mxu0 %v3911_v13  ;;  %v4004_v12 = vld [vmem:[%s4712_s10 + $0x7ac] ss:$16 sps:$4 sm:$0xff]   ;;  %v3999_v13 = vld [vmem:[%s4712_s10 + $0x5a8] ss:$16 sps:$4 sm:$0xff]  }
 0x18e   : > { %2185 = vmatprep.subr.bf16.mxu1 %v3914_v14  ;;  %v4002_v14 = vld [vmem:[%s4712_s10 + $0x7a8] ss:$16 sps:$4 sm:$0xff]  }
 0x190   : > { %2145 = vmatpush1.bf16.msra.mxu0 %v3909_v15  ;;  %v4007_v15 = vld [vmem:[%s4712_s10 + $0x5cc] ss:$16 sps:$4 sm:$0xff]  }
 0x191   : > { %2186 = vmatpush1.bf16.msra.mxu1 %v3912_v16  ;;  %2146 = vmatprep.subr.bf16.mxu0 %v3917_v19  ;;  %v4010_v16 = vld [vmem:[%s4712_s10 + $0x7cc] ss:$16 sps:$4 sm:$0xff]   ;;  %v4005_v19 = vld [vmem:[%s4712_s10 + $0x5c8] ss:$16 sps:$4 sm:$0xff]  }
 0x192   : > { %2187 = vmatprep.subr.bf16.mxu1 %v3920_v20  ;;  %v4008_v20 = vld [vmem:[%s4712_s10 + $0x7c8] ss:$16 sps:$4 sm:$0xff]  }
 0x194   : > { %2147 = vmatpush1.bf16.msra.mxu0 %v3915_v21  ;;  %v4013_v21 = vld [vmem:[%s4712_s10 + $0x5ec] ss:$16 sps:$4 sm:$0xff]  }
 0x195   : > { %2188 = vmatpush1.bf16.msra.mxu1 %v3918_v22  ;;  %2198 = vmatprep.subr.bf16.mxu0 %v3923_v23  ;;  %v4016_v22 = vld [vmem:[%s4712_s10 + $0x7ec] ss:$16 sps:$4 sm:$0xff]   ;;  %v4011_v23 = vld [vmem:[%s4712_s10 + $0x5e8] ss:$16 sps:$4 sm:$0xff]  }
 0x196   : > { %2239 = vmatprep.subr.bf16.mxu1 %v3926_v24  ;;  %v4014_v24 = vld [vmem:[%s4712_s10 + $0x7e8] ss:$16 sps:$4 sm:$0xff]  }
 0x197   : > { %2149 = vmatmul.mubr.bf16.vlgmr.msra.gmra.mrb[8].mxu0 %v4809_v7  ;;  %v3933_v7 = vld [vmem:[%s4712_s10 + $0x448] ss:$16 sps:$4 sm:$0xff]  }
 0x198   : > { %2190 = vmatmul.mubr.bf16.vlgmr.msra.gmra.mrb[8].mxu1 %v4811_v8  ;;  %2199 = vmatpush1.bf16.msra.mxu0 %v3921_v25  ;;  %v3936_v8 = vld [vmem:[%s4712_s10 + $0x648] ss:$16 sps:$4 sm:$0xff]  }
 0x199   : > { %2240 = vmatpush1.bf16.msra.mxu1 %v3924_v26  ;;  %2200 = vmatprep.subr.bf16.mxu0 %v3929_v27 }
 0x19a   : > { %2241 = vmatprep.subr.bf16.mxu1 %v3932_v28  ;;  %2230 = vmatprep.mubr.bf16.mxu0 %v4849_v37  ;;  %v3942_v37 = vld [vmem:[%s4712_s10 + $0x668] ss:$16 sps:$4 sm:$0xff]  }
 0x19b   : > { %2271 = vmatprep.mubr.bf16.mxu1 %v4853_v38  ;;  %v3947_v38 = vld [vmem:[%s4712_s10 + $0x48c] ss:$16 sps:$4 sm:$0xff]  }
 0x19c   : > { %2201 = vmatpush1.bf16.msra.mxu0 %v3927_v29 }
 0x19d   : > { %2242 = vmatpush1.bf16.msra.mxu1 %v3930_v30  ;;  %2202 = vmatprep.subr.bf16.mxu0 %v3935_v31 }
 0x19e   : > { %2243 = vmatprep.subr.bf16.mxu1 %v3938_v32 }
 0x1a0   : > { %2203 = vmatpush1.bf16.msra.mxu0 %v3933_v7 }
 0x1a1   : > { %2244 = vmatpush1.bf16.msra.mxu1 %v3936_v8  ;;  %2204 = vmatprep.subr.bf16.mxu0 %v3941_v48 }
 0x1a2   : > { %2245 = vmatprep.subr.bf16.mxu1 %v3944_v52 }
 0x1a4   : > { %2205 = vmatpush1.bf16.msra.mxu0 %v3939_v33 }
 0x1a5   : > { %2246 = vmatpush1.bf16.msra.mxu1 %v3942_v37  ;;  %2206 = vmatprep.subr.bf16.mxu0 %v3947_v38 }
 0x1a6   : > { %2247 = vmatprep.subr.bf16.mxu1 %v3950_v34  ;;  %v384_v34 = vld [vmem:[#allocation2] sm:$0xff] }
 0x1a8   : > { %2207 = vmatpush1.bf16.msra.mxu0 %v3945_v35 }
 0x1a9   : > { %2248 = vmatpush1.bf16.msra.mxu1 %v3948_v36  ;;  %2208 = vmatprep.subr.bf16.mxu0 %v3953_v39  ;;  %v385_v39 = vld [vmem:[#allocation2 + $0x8] sm:$0xff] }
 0x1aa   : > { %2249 = vmatprep.subr.bf16.mxu1 %v3956_v40 }
 0x1ac   : > { %2209 = vmatpush1.bf16.msra.mxu0 %v3951_v41 }
 0x1ad   : > { %2250 = vmatpush1.bf16.msra.mxu1 %v3954_v42  ;;  %2210 = vmatprep.subr.bf16.mxu0 %v3959_v43 }
 0x1ae   : > { %2251 = vmatprep.subr.bf16.mxu1 %v3962_v44 }
 0x1b0   : > { %2211 = vmatpush1.bf16.msra.mxu0 %v3957_v45 }
 0x1b1   : > { %2252 = vmatpush1.bf16.msra.mxu1 %v3960_v46  ;;  %2212 = vmatprep.subr.bf16.mxu0 %v3965_v47 }
 0x1b2   : > { %2253 = vmatprep.subr.bf16.mxu1 %v3968_v49 }
 0x1b4   : > { %2213 = vmatpush1.bf16.msra.mxu0 %v3963_v50 }
 0x1b5   : > { %2254 = vmatpush1.bf16.msra.mxu1 %v3966_v51  ;;  %2214 = vmatprep.subr.bf16.mxu0 %v3971_v53 }
 0x1b6   : > { %2255 = vmatprep.subr.bf16.mxu1 %v3974_v54 }
 0x1b8   : > { %2215 = vmatpush1.bf16.msra.mxu0 %v3969_v55 }
 0x1b9   : > { %2256 = vmatpush1.bf16.msra.mxu1 %v3972_v56  ;;  %2216 = vmatprep.subr.bf16.mxu0 %v3977_v57 }
 0x1ba   : > { %2257 = vmatprep.subr.bf16.mxu1 %v3980_v58 }
 0x1bc   : > { %2217 = vmatpush1.bf16.msra.mxu0 %v3975_v59 }
 0x1bd   : > { %2258 = vmatpush1.bf16.msra.mxu1 %v3978_v60  ;;  %2218 = vmatprep.subr.bf16.mxu0 %v3983_v61 }
 0x1be   : > { %2259 = vmatprep.subr.bf16.mxu1 %v3986_v62  ;;  %v386_v62 = vld [vmem:[#allocation2 + $0x10] sm:$0xff] }
 0x1c0   : > { %2219 = vmatpush1.bf16.msra.mxu0 %v3981_v63 }
 0x1c1   : > { %2260 = vmatpush1.bf16.msra.mxu1 %v3984_v0  ;;  %2220 = vmatprep.subr.bf16.mxu0 %v3989_v1 }
 0x1c2   : > { %2261 = vmatprep.subr.bf16.mxu1 %v3992_v2 }
 0x1c4   : > { %2221 = vmatpush1.bf16.msra.mxu0 %v3987_v3  ;;  %v387_v3 = vld [vmem:[#allocation2 + $0x18] sm:$0xff] }
 0x1c5   : > { %2262 = vmatpush1.bf16.msra.mxu1 %v3990_v4  ;;  %2222 = vmatprep.subr.bf16.mxu0 %v3995_v5 }
 0x1c6   : > { %2263 = vmatprep.subr.bf16.mxu1 %v3998_v6 }
 0x1c8   : > { %2223 = vmatpush1.bf16.msra.mxu0 %v3993_v9 }
 0x1c9   : > { %2264 = vmatpush1.bf16.msra.mxu1 %v3996_v10  ;;  %2224 = vmatprep.subr.bf16.mxu0 %v4001_v11  ;;  %v4017_v11 = vld [vmem:[#allocation9 + $0x4] ss:$8 sps:$4 sm:$0xff] (!%p3394_p0)  }
 0x1ca   : > { %2265 = vmatprep.subr.bf16.mxu1 %v4004_v12  ;;  %v4019_v12 = vld [vmem:[#allocation9 + $0x104] ss:$8 sps:$4 sm:$0xff] (!%p3394_p0)  }
 0x1cc   : > { %2225 = vmatpush1.bf16.msra.mxu0 %v3999_v13  ;;  %v4021_v13 = vld [vmem:[#allocation9] ss:$8 sps:$4 sm:$0xff] (!%p3394_p0)  }
 0x1cd   : > { %2266 = vmatpush1.bf16.msra.mxu1 %v4002_v14  ;;  %2226 = vmatprep.subr.bf16.mxu0 %v4007_v15  ;;  %v4022_v14 = vld [vmem:[#allocation9 + $0x100] ss:$8 sps:$4 sm:$0xff] (!%p3394_p0)   ;;  %v4023_v15 = vld [vmem:[#allocation9 + $0x14] ss:$8 sps:$4 sm:$0xff] (!%p3394_p0)  }
 0x1ce   : > { %2267 = vmatprep.subr.bf16.mxu1 %v4010_v16  ;;  %v4025_v16 = vld [vmem:[#allocation9 + $0x114] ss:$8 sps:$4 sm:$0xff] (!%p3394_p0)  }
 0x1d0   : > { %2227 = vmatpush1.bf16.msra.mxu0 %v4005_v19  ;;  %v4027_v19 = vld [vmem:[#allocation9 + $0x10] ss:$8 sps:$4 sm:$0xff] (!%p3394_p0)  }
 0x1d1   : > { %2268 = vmatpush1.bf16.msra.mxu1 %v4008_v20  ;;  %2228 = vmatprep.subr.bf16.mxu0 %v4013_v21  ;;  %v4028_v20 = vld [vmem:[#allocation9 + $0x110] ss:$8 sps:$4 sm:$0xff] (!%p3394_p0)   ;;  %v4029_v21 = vld [vmem:[#allocation9 + $0x24] ss:$8 sps:$4 sm:$0xff] (!%p3394_p0)  }
 0x1d2   : > { %2269 = vmatprep.subr.bf16.mxu1 %v4016_v22  ;;  %v4031_v22 = vld [vmem:[#allocation9 + $0x124] ss:$8 sps:$4 sm:$0xff] (!%p3394_p0)  }
 0x1d4   : > { %2229 = vmatpush1.bf16.msra.mxu0 %v4011_v23  ;;  %v4033_v23 = vld [vmem:[#allocation9 + $0x20] ss:$8 sps:$4 sm:$0xff] (!%p3394_p0)  }
 0x1d5   : > { %2270 = vmatpush1.bf16.msra.mxu1 %v4014_v24  ;;  %2767 = vmatprep.subr.bf16.mxu0 (!%p3394_p0), %v4019_v12  ;;  %v4034_v24 = vld [vmem:[#allocation9 + $0x120] ss:$8 sps:$4 sm:$0xff] (!%p3394_p0)   ;;  %v4095_v12 = vld [vmem:[#allocation9 + $0xd4] ss:$8 sps:$4 sm:$0xff] (!%p3394_p0)  }
 0x1d6   : > { %2726 = vmatprep.subr.bf16.mxu1 (!%p3394_p0), %v4017_v11  ;;  %v4094_v11 = vld [vmem:[#allocation9 + $0x1c0] ss:$8 sps:$4 sm:$0xff] (!%p3394_p0)  }
 0x1d7   : > { %2231 = vmatmul.mubr.bf16.vlgmr.msra.gmra.mrb[12].mxu0 %v4897_v17 }
 0x1d8   : > { %2272 = vmatmul.mubr.bf16.vlgmr.msra.gmra.mrb[12].mxu1 %v4901_v18  ;;  %2768 = vmatpush1.bf16.msra.mxu0 (!%p3394_p0), %v4022_v14 }
 0x1d9   : > { %2727 = vmatpush1.bf16.msra.mxu1 (!%p3394_p0), %v4021_v13  ;;  %2769 = vmatprep.subr.bf16.mxu0 (!%p3394_p0), %v4025_v16  ;;  %v4099_v16 = vld [vmem:[#allocation9 + $0xd0] ss:$8 sps:$4 sm:$0xff] (!%p3394_p0)  }
 0x1da   : > { %2728 = vmatprep.subr.bf16.mxu1 (!%p3394_p0), %v4023_v15  ;;  %v4097_v15 = vld [vmem:[#allocation9 + $0x1d4] ss:$8 sps:$4 sm:$0xff] (!%p3394_p0)  }
 0x1dc   : > { %2770 = vmatpush1.bf16.msra.mxu0 (!%p3394_p0), %v4028_v20 }
 0x1dd   : > { %2729 = vmatpush1.bf16.msra.mxu1 (!%p3394_p0), %v4027_v19  ;;  %2771 = vmatprep.subr.bf16.mxu0 (!%p3394_p0), %v4031_v22  ;;  %v4100_v19 = vld [vmem:[#allocation9 + $0x1d0] ss:$8 sps:$4 sm:$0xff] (!%p3394_p0)   ;;  %v4101_v22 = vld [vmem:[#allocation9 + $0xe4] ss:$8 sps:$4 sm:$0xff] (!%p3394_p0)  }
 0x1de   : > { %2730 = vmatprep.subr.bf16.mxu1 (!%p3394_p0), %v4029_v21 }
 0x1e0   : > { %2772 = vmatpush1.bf16.msra.mxu0 (!%p3394_p0), %v4034_v24 }
 0x1e1   : > { %2731 = vmatpush1.bf16.msra.mxu1 (!%p3394_p0), %v4033_v23 }
 0x1ea   : > { %v1986_v25 = vpop.f32.mrb[0].mxu0 }
 0x1eb   : > { %v2027_v26 = vpop.f32.mrb[0].mxu1  ;;  %v1988_v28 = vpop.f32.mrb[1].mxu0 }
 0x1ec   : > { %v2028_v27 = vadd.f32 %v2027_v26, %v1986_v25  ;;  %v2029_v29 = vpop.f32.mrb[1].mxu1  ;;  %v1990_v31 = vpop.f32.mrb[2].mxu0  ;;  %v4035_v25 = vld [vmem:[#allocation9 + $0x34] ss:$8 sps:$4 sm:$0xff] (!%p3394_p0)  }
 0x1ed   : > { %v2030_v30 = vadd.f32 %v2029_v29, %v1988_v28  ;;  %v2031_v32 = vpop.f32.mrb[2].mxu1  ;;  %v1991_v7 = vpop.f32.mrb[3].mxu0  ;;  %v4037_v26 = vld [vmem:[#allocation9 + $0x134] ss:$8 sps:$4 sm:$0xff] (!%p3394_p0)   ;;  %v4040_v28 = vld [vmem:[#allocation9 + $0x130] ss:$8 sps:$4 sm:$0xff] (!%p3394_p0)   ;;  %2732 = vmatprep.subr.bf16.mxu1 (!%p3394_p0), %v4035_v25 }
 0x1ee   : > { %v2032_v8 = vpop.f32.mrb[3].mxu1  ;;  %v4041_v29 = vld [vmem:[#allocation9 + $0x44] ss:$8 sps:$4 sm:$0xff] (!%p3394_p0)   ;;  %2773 = vmatprep.subr.bf16.mxu0 (!%p3394_p0), %v4037_v26  ;;  %v4045_v31 = vld [vmem:[#allocation9 + $0x40] ss:$8 sps:$4 sm:$0xff] (!%p3394_p0)  }
 0x1ef   : > { %v4046_v32 = vld [vmem:[#allocation9 + $0x140] ss:$8 sps:$4 sm:$0xff] (!%p3394_p0)   ;;  %2774 = vmatpush1.bf16.msra.mxu0 (!%p3394_p0), %v4040_v28  ;;  %v4047_v7 = vld [vmem:[#allocation9 + $0x54] ss:$8 sps:$4 sm:$0xff] (!%p3394_p0)  }
 0x1f0   : > { %v4049_v8 = vld [vmem:[#allocation9 + $0x154] ss:$8 sps:$4 sm:$0xff] (!%p3394_p0)   ;;  %v4105_v28 = vld [vmem:[#allocation9 + $0xe0] ss:$8 sps:$4 sm:$0xff] (!%p3394_p0)  }
 0x22a   : > { %v2068_v48 = vpop.f32.mrb[4].mxu0 }
 0x22b   : > { %v2109_v52 = vpop.f32.mrb[4].mxu1  ;;  %v2069_v33 = vadd.f32 %v2068_v48, %v2028_v27  ;;  %v2070_v37 = vpop.f32.mrb[5].mxu0  ;;  %v4039_v27 = vld [vmem:[#allocation9 + $0x30] ss:$8 sps:$4 sm:$0xff] (!%p3394_p0)  }
 0x22c   : > { %v2111_v38 = vpop.f32.mrb[5].mxu1  ;;  %v2071_v35 = vadd.f32 %v2070_v37, %v2030_v30  ;;  %v2072_v17 = vpop.f32.mrb[6].mxu0  ;;  %v4043_v30 = vld [vmem:[#allocation9 + $0x144] ss:$8 sps:$4 sm:$0xff] (!%p3394_p0)   ;;  %2733 = vmatpush1.bf16.msra.mxu1 (!%p3394_p0), %v4039_v27  ;;  %v4051_v48 = vld [vmem:[#allocation9 + $0x50] ss:$8 sps:$4 sm:$0xff] (!%p3394_p0)  }
 0x22d   : > { %v2113_v36 = vpop.f32.mrb[6].mxu1  ;;  %v2110_v18 = vadd.f32 %v2109_v52, %v2069_v33  ;;  %v2073_v40 = vpop.f32.mrb[7].mxu0  ;;  %2734 = vmatprep.subr.bf16.mxu1 (!%p3394_p0), %v4041_v29  ;;  %2775 = vmatprep.subr.bf16.mxu0 (!%p3394_p0), %v4043_v30  ;;  %v4052_v52 = vld [vmem:[#allocation9 + $0x150] ss:$8 sps:$4 sm:$0xff] (!%p3394_p0)   ;;  %v4053_v33 = vld [vmem:[#allocation9 + $0x64] ss:$8 sps:$4 sm:$0xff] (!%p3394_p0)  }
 0x22e   : > { %v2114_v41 = vpop.f32.mrb[7].mxu1  ;;  %v2112_v42 = vadd.f32 %v2111_v38, %v2071_v35  ;;  %2776 = vmatpush1.bf16.msra.mxu0 (!%p3394_p0), %v4046_v32  ;;  %v4055_v37 = vld [vmem:[#allocation9 + $0x164] ss:$8 sps:$4 sm:$0xff] (!%p3394_p0)   ;;  %v4057_v38 = vld [vmem:[#allocation9 + $0x60] ss:$8 sps:$4 sm:$0xff] (!%p3394_p0)  }
 0x22f   : > { %v2280_v43 = vadd.f32 %v2110_v18, %v384_v34  ;;  %2777 = vmatprep.subr.bf16.mxu0 (!%p3394_p0), %v4049_v8  ;;  %v4058_v34 = vld [vmem:[#allocation9 + $0x160] ss:$8 sps:$4 sm:$0xff] (!%p3394_p0)   ;;  %v4059_v35 = vld [vmem:[#allocation9 + $0x74] ss:$8 sps:$4 sm:$0xff] (!%p3394_p0)   ;;  %v4063_v36 = vld [vmem:[#allocation9 + $0x70] ss:$8 sps:$4 sm:$0xff] (!%p3394_p0)  }
 0x230   : > { %v2281_v44 = vadd.f32 %v2112_v42, %v385_v39  ;;  %2735 = vmatpush1.bf16.msra.mxu1 (!%p3394_p0), %v4045_v31  ;;  %v4061_v17 = vld [vmem:[#allocation9 + $0x174] ss:$8 sps:$4 sm:$0xff] (!%p3394_p0)   ;;  %v4064_v18 = vld [vmem:[#allocation9 + $0x170] ss:$8 sps:$4 sm:$0xff] (!%p3394_p0)   ;;  %v4065_v39 = vld [vmem:[#allocation9 + $0x84] ss:$8 sps:$4 sm:$0xff] (!%p3394_p0)  }
 0x231   : > { %2284 = vst [vmem:[#allocation2] sm:$0xff] %v2280_v43  ;;  %2736 = vmatprep.subr.bf16.mxu1 (!%p3394_p0), %v4047_v7  ;;  %v4067_v40 = vld [vmem:[#allocation9 + $0x184] ss:$8 sps:$4 sm:$0xff] (!%p3394_p0)   ;;  %v4069_v41 = vld [vmem:[#allocation9 + $0x80] ss:$8 sps:$4 sm:$0xff] (!%p3394_p0)  }
 0x232   : > { %2285 = vst [vmem:[#allocation2 + $0x8] sm:$0xff] %v2281_v44  ;;  %2778 = vmatpush1.bf16.msra.mxu0 (!%p3394_p0), %v4052_v52  ;;  %v4070_v42 = vld [vmem:[#allocation9 + $0x180] ss:$8 sps:$4 sm:$0xff] (!%p3394_p0)   ;;  %v4071_v43 = vld [vmem:[#allocation9 + $0x94] ss:$8 sps:$4 sm:$0xff] (!%p3394_p0)   ;;  %v2298_v44 = vlaneseq (!%p3394_p0) }
 0x233   : > { %2779 = vmatprep.subr.bf16.mxu0 (!%p3394_p0), %v4055_v37  ;;  %v4103_v27 = vld [vmem:[#allocation9 + $0x1e4] ss:$8 sps:$4 sm:$0xff] (!%p3394_p0)   ;;  %v4106_v29 = vld [vmem:[#allocation9 + $0x1e0] ss:$8 sps:$4 sm:$0xff] (!%p3394_p0)   ;;  %v4107_v30 = vld [vmem:[#allocation9 + $0xf4] ss:$8 sps:$4 sm:$0xff] (!%p3394_p0)  }
 0x234   : > { %2737 = vmatpush1.bf16.msra.mxu1 (!%p3394_p0), %v4051_v48  ;;  %v4109_v31 = vld [vmem:[#allocation9 + $0x1f4] ss:$8 sps:$4 sm:$0xff] (!%p3394_p0)   ;;  %v4111_v52 = vld [vmem:[#allocation9 + $0xf0] ss:$8 sps:$4 sm:$0xff] (!%p3394_p0)   ;;  %v4113_v37 = vld [vmem:[#allocation12 + $0x40] sm:$0xff] (!%p3394_p0)  }
 0x235   : > { %2738 = vmatprep.subr.bf16.mxu1 (!%p3394_p0), %v4053_v33  ;;  %v4112_v33 = vld [vmem:[#allocation9 + $0x1f0] ss:$8 sps:$4 sm:$0xff] (!%p3394_p0)  }
 0x236   : > { %2780 = vmatpush1.bf16.msra.mxu0 (!%p3394_p0), %v4058_v34 }
 0x237   : > { %2781 = vmatprep.subr.bf16.mxu0 (!%p3394_p0), %v4061_v17  ;;  %v4115_v17 = vld [vmem:[#allocation12 + $0x48] sm:$0xff] (!%p3394_p0)  }
 0x238   : > { %2739 = vmatpush1.bf16.msra.mxu1 (!%p3394_p0), %v4057_v38  ;;  %v2292_v23 = vld [vmem:[#allocation2] sm:$0xff] (!%p3394_p0) }
 0x239   : > { %2740 = vmatprep.subr.bf16.mxu1 (!%p3394_p0), %v4059_v35  ;;  %v4114_v35 = vld [vmem:[#allocation12] sm:$0xff] (!%p3394_p0)  }
 0x23a   : > { %2782 = vmatpush1.bf16.msra.mxu0 (!%p3394_p0), %v4064_v18  ;;  %v4117_v18 = vld [vmem:[#allocation12 + $0x50] sm:$0xff] (!%p3394_p0)  }
 0x23b   : > { %2783 = vmatprep.subr.bf16.mxu0 (!%p3394_p0), %v4067_v40  ;;  %v4119_v40 = vld [vmem:[#allocation12 + $0x58] sm:$0xff] (!%p3394_p0)  }
 0x23c   : > { %2741 = vmatpush1.bf16.msra.mxu1 (!%p3394_p0), %v4063_v36  ;;  %v4116_v36 = vld [vmem:[#allocation12 + $0x8] sm:$0xff] (!%p3394_p0)  }
 0x23d   : > { %2742 = vmatprep.subr.bf16.mxu1 (!%p3394_p0), %v4065_v39  ;;  %v4118_v39 = vld [vmem:[#allocation12 + $0x10] sm:$0xff] (!%p3394_p0)  }
 0x23e   : > { %2784 = vmatpush1.bf16.msra.mxu0 (!%p3394_p0), %v4070_v42  ;;  %v4121_v42 = vld [vmem:[#allocation12 + $0x60] sm:$0xff] (!%p3394_p0)  }
 0x240   : > { %2743 = vmatpush1.bf16.msra.mxu1 (!%p3394_p0), %v4069_v41  ;;  %v4120_v41 = vld [vmem:[#allocation12 + $0x18] sm:$0xff] (!%p3394_p0)  }
 0x241   : > { %2744 = vmatprep.subr.bf16.mxu1 (!%p3394_p0), %v4071_v43  ;;  %v4122_v43 = vld [vmem:[#allocation12 + $0x20] sm:$0xff] (!%p3394_p0)  }
 0x26a   : > { %v2150_v45 = vpop.f32.mrb[8].mxu0 }
 0x26b   : > { %v2191_v46 = vpop.f32.mrb[8].mxu1  ;;  %v2152_v49 = vpop.f32.mrb[9].mxu0 }
 0x26c   : > { %v2192_v47 = vadd.f32 %v2191_v46, %v2150_v45  ;;  %v2193_v50 = vpop.f32.mrb[9].mxu1  ;;  %v2154_v53 = vpop.f32.mrb[10].mxu0  ;;  %v4073_v45 = vld [vmem:[#allocation9 + $0x194] ss:$8 sps:$4 sm:$0xff] (!%p3394_p0)   ;;  %v4075_v46 = vld [vmem:[#allocation9 + $0x90] ss:$8 sps:$4 sm:$0xff] (!%p3394_p0)  }
 0x26d   : > { %v2194_v51 = vadd.f32 %v2193_v50, %v2152_v49  ;;  %v2195_v54 = vpop.f32.mrb[10].mxu1  ;;  %v2155_v55 = vpop.f32.mrb[11].mxu0  ;;  %v4077_v49 = vld [vmem:[#allocation9 + $0xa4] ss:$8 sps:$4 sm:$0xff] (!%p3394_p0)   ;;  %v5040_v50 = vshrl.u32 (!%p3394_p0), %v2298_v44, 7  ;;  %2785 = vmatprep.subr.bf16.mxu0 (!%p3394_p0), %v4073_v45  ;;  %2745 = vmatpush1.bf16.msra.mxu1 (!%p3394_p0), %v4075_v46  ;;  %v4125_v46 = vld [vmem:[#allocation12 + $0x70] sm:$0xff] (!%p3394_p0)  }
 0x26e   : > { %v2196_v56 = vpop.f32.mrb[11].mxu1  ;;  %v4081_v53 = vld [vmem:[#allocation9 + $0xa0] ss:$8 sps:$4 sm:$0xff] (!%p3394_p0)   ;;  %v4083_v55 = vld [vmem:[#allocation9 + $0xb4] ss:$8 sps:$4 sm:$0xff] (!%p3394_p0)   ;;  %2746 = vmatprep.subr.bf16.mxu1 (!%p3394_p0), %v4077_v49 }
 0x26f   : > { %v4082_v54 = vld [vmem:[#allocation9 + $0x1a0] ss:$8 sps:$4 sm:$0xff] (!%p3394_p0)   ;;  %v2304_v56 = vsub.s32 (!%p3394_p0), 1, %v5040_v50 }
 0x270   : > { %v4123_v44 = vld [vmem:[#allocation12 + $0x68] sm:$0xff] (!%p3394_p0)   ;;  %v4127_v49 = vld [vmem:[#allocation12 + $0x78] sm:$0xff] (!%p3394_p0)  }
 0x271   : > { %2747 = vmatpush1.bf16.msra.mxu1 (!%p3394_p0), %v4081_v53  ;;  %v4124_v45 = vld [vmem:[#allocation12 + $0x28] sm:$0xff] (!%p3394_p0)   ;;  %v2394_v53 = vld [vmem:[#allocation11] sm:$0x3] (!%p3394_p0) }
 0x272   : > { %2748 = vmatprep.subr.bf16.mxu1 (!%p3394_p0), %v4083_v55  ;;  %v2403_v55 = vrot.slane (!%p3394_p0), %v2394_v53, %v2304_v56 }
 0x2aa   : > { %v2232_v57 = vpop.f32.mrb[12].mxu0 }
 0x2ab   : > { %v2273_v58 = vpop.f32.mrb[12].mxu1  ;;  %v2233_v59 = vadd.f32 %v2232_v57, %v2192_v47  ;;  %v2234_v60 = vpop.f32.mrb[13].mxu0  ;;  %v4076_v47 = vld [vmem:[#allocation9 + $0x190] ss:$8 sps:$4 sm:$0xff] (!%p3394_p0)   ;;  %v2312_v57 = vsub.s32 (!%p3394_p0), 3, %v5040_v50 }
 0x2ac   : > { %v2275_v61 = vpop.f32.mrb[13].mxu1  ;;  %v2235_v63 = vadd.f32 %v2234_v60, %v2194_v51  ;;  %v2236_v0 = vpop.f32.mrb[14].mxu0  ;;  %2291 = sbr.rel (%p3394_p0) target bundleno = 1149 (0x47d), region = 84  ;;  %v4079_v51 = vld [vmem:[#allocation9 + $0x1a4] ss:$8 sps:$4 sm:$0xff] (!%p3394_p0)   ;;  %2786 = vmatpush1.bf16.msra.mxu0 (!%p3394_p0), %v4076_v47  ;;  %v4126_v47 = vld [vmem:[#allocation12 + $0x30] sm:$0xff] (!%p3394_p0)  }
 0x2ad   : > { %v2277_v1 = vpop.f32.mrb[14].mxu1  ;;  %v2274_v2 = vadd.f32 %v2273_v58, %v2233_v59  ;;  %v2237_v4 = vpop.f32.mrb[15].mxu0  ;;  %2787 = vmatprep.subr.bf16.mxu0 (!%p3394_p0), %v4079_v51  ;;  %v4085_v58 = vld [vmem:[#allocation9 + $0x1b4] ss:$8 sps:$4 sm:$0xff] (!%p3394_p0)   ;;  %v4087_v59 = vld [vmem:[#allocation9 + $0xb0] ss:$8 sps:$4 sm:$0xff] (!%p3394_p0)  }
 0x2ae   : > { %v2278_v5 = vpop.f32.mrb[15].mxu1  ;;  %v2276_v6 = vadd.f32 %v2275_v61, %v2235_v63  ;;  %v4088_v60 = vld [vmem:[#allocation9 + $0x1b0] ss:$8 sps:$4 sm:$0xff] (!%p3394_p0)   ;;  %v2293_v61 = vld [vmem:[#allocation2 + $0x8] sm:$0xff] (!%p3394_p0)  ;;  %v2300_v0 = vsub.s32 (!%p3394_p0), 0, %v5040_v50  ;;  %v2308_v1 = vsub.s32 (!%p3394_p0), 2, %v5040_v50  ;;  %2749 = vmatpush1.bf16.msra.mxu1 (!%p3394_p0), %v4087_v59 }
 0x2af   : > { %v2282_v9 = vadd.f32 %v2274_v2, %v386_v62  ;;  %v2296_v62 = vld [vmem:[#allocation8] sm:$0xf] (!%p3394_p0)  ;;  %v4089_v2 = vld [vmem:[#allocation9 + $0xc4] ss:$8 sps:$4 sm:$0xff] (!%p3394_p0)  }
 0x2b0   : > { %v2283_v10 = vadd.f32 %v2276_v6, %v387_v3  ;;  %2788 = vmatpush1.bf16.msra.mxu0 (!%p3394_p0), %v4082_v54  ;;  %v2305_v3 = vrot.slane (!%p3394_p0), %v2296_v62, %v2304_v56  ;;  %v2313_v4 = vrot.slane (!%p3394_p0), %v2296_v62, %v2312_v57  ;;  %v4091_v5 = vld [vmem:[#allocation9 + $0x1c4] ss:$8 sps:$4 sm:$0xff] (!%p3394_p0)   ;;  %v4093_v6 = vld [vmem:[#allocation9 + $0xc0] ss:$8 sps:$4 sm:$0xff] (!%p3394_p0)   ;;  %2750 = vmatprep.subr.bf16.mxu1 (!%p3394_p0), %v4089_v2 }
 0x2b1   : > { %2286 = vst [vmem:[#allocation2 + $0x10] sm:$0xff] %v2282_v9  ;;  %2789 = vmatprep.subr.bf16.mxu0 (!%p3394_p0), %v4085_v58  ;;  %v2301_v24 = vrot.slane (!%p3394_p0), %v2296_v62, %v2300_v0  ;;  %v2309_v25 = vrot.slane (!%p3394_p0), %v2296_v62, %v2308_v1  ;;  %v4128_v51 = vld [vmem:[#allocation12 + $0x38] sm:$0xff] (!%p3394_p0)   ;;  %v2399_v54 = vrot.slane (!%p3394_p0), %v2394_v53, %v2300_v0  ;;  %v3459_v56 = vld [vmem:[#allocation14] ss:$0 sm:$0xff] (!%p3394_p0) }
 0x2b2   : > { %2287 = vst [vmem:[#allocation2 + $0x18] sm:$0xff] %v2283_v10  ;;  %v2319_v9 = vadd.f32 (!%p3394_p0), %v2305_v3, %v2293_v61  ;;  %2751 = vmatpush1.bf16.msra.mxu1 (!%p3394_p0), %v4093_v6 }
 0x2b3   : > { %2752 = vmatprep.subr.bf16.mxu1 %v4095_v12  ;;  %v2318_v32 = vadd.f32 %v2301_v24, %v2292_v23 }
 0x2b4   : > { %2790 = vmatpush1.bf16.msra.mxu0 %v4088_v60  ;;  %v2323_v13 = vmax.f32 %v2319_v9, 0.0 }
 0x2b5   : > { %2791 = vmatprep.subr.bf16.mxu0 %v4091_v5  ;;  %v2322_v8 = vmax.f32 %v2318_v32, 0.0 }
 0x2b6   : > { %v2327_v20 = vpack.c.bf16 %v2323_v13, %v2323_v13  ;;  %2753 = vmatpush1.bf16.msra.mxu1 %v4099_v16 }
 0x2b7   : > { %2754 = vmatprep.subr.bf16.mxu1 %v4101_v22  ;;  %v2326_v38 = vpack.c.bf16 %v2322_v8, %v2322_v8 }
 0x2b8   : > { %2792 = vmatpush1.bf16.msra.mxu0 %v4094_v11  ;;  %v2294_v26 = vld [vmem:[#allocation2 + $0x10] sm:$0xff]  ;;  %2758 = vmatprep.mubr.bf16.mxu1 %v2327_v20 }
 0x2b9   : > { %v2295_v63 = vld [vmem:[#allocation2 + $0x18] sm:$0xff]  ;;  %2793 = vmatprep.subr.bf16.mxu0 %v4097_v15  ;;  %v2320_v7 = vadd.f32 %v2309_v25, %v2294_v26 }
 0x2ba   : > { %v2321_v10 = vadd.f32 %v2313_v4, %v2295_v63  ;;  %2755 = vmatpush1.bf16.msra.mxu1 %v4105_v28 }
 0x2bb   : > { %v2324_v48 = vmax.f32 %v2320_v7, 0.0  ;;  %2756 = vmatprep.subr.bf16.mxu1 %v4107_v30 }
 0x2bc   : > { %v2325_v14 = vmax.f32 %v2321_v10, 0.0  ;;  %2794 = vmatpush1.bf16.msra.mxu0 %v4100_v19 }
 0x2bd   : > { %2795 = vmatprep.subr.bf16.mxu0 %v4103_v27  ;;  %v2328_v34 = vpack.c.bf16 %v2324_v48, %v2324_v48 }
 0x2be   : > { %v2329_v21 = vpack.c.bf16 %v2325_v14, %v2325_v14  ;;  %2757 = vmatpush1.bf16.msra.mxu1 %v4111_v52 }
 0x2bf   : > { %3483 = vmatprep.subr.bf16.mxu1 %v4113_v37 }
 0x2c0   : > { %2799 = vmatprep.mubr.bf16.mxu0 %v2329_v21  ;;  %2796 = vmatpush1.bf16.msra.mxu0 %v4106_v29 }
 0x2c1   : > { %2797 = vmatprep.subr.bf16.mxu0 %v4109_v31  ;;  %2759 = vmatmul.mubr.bf16.vlgmr.msra.gmra.mrb[0].mxu1 %v2326_v38 }
 0x2c2   : > { %3484 = vmatpush3.bf16.msra.mxu1 %v4114_v35 }
 0x2c3   : > { %3485 = vmatprep.subr.bf16.mxu1 %v4115_v17 }
 0x2c4   : > { %2798 = vmatpush1.bf16.msra.mxu0 %v4112_v33 }
 0x2c6   : > { %3486 = vmatpush3.bf16.msra.mxu1 %v4116_v36 }
 0x2c7   : > { %2800 = vmatmul.mubr.bf16.vlgmr.msra.gmra.mrb[0].mxu0 %v2328_v34  ;;  %3487 = vmatprep.subr.bf16.mxu1 %v4117_v18 }
 0x2ca   : > { %3488 = vmatpush3.bf16.msra.mxu1 %v4118_v39 }
 0x2cb   : > { %3489 = vmatprep.subr.bf16.mxu1 %v4119_v40 }
 0x2ce   : > { %3490 = vmatpush3.bf16.msra.mxu1 %v4120_v41 }
 0x2cf   : > { %3491 = vmatprep.subr.bf16.mxu1 %v4121_v42 }
 0x2d2   : > { %3492 = vmatpush3.bf16.msra.mxu1 %v4122_v43 }
 0x2d3   : > { %3493 = vmatprep.subr.bf16.mxu1 %v4123_v44 }
 0x2d6   : > { %3494 = vmatpush3.bf16.msra.mxu1 %v4124_v45 }
 0x2d7   : > { %3495 = vmatprep.subr.bf16.mxu1 %v4125_v46 }
 0x2da   : > { %3496 = vmatpush3.bf16.msra.mxu1 %v4126_v47 }
 0x2db   : > { %3497 = vmatprep.subr.bf16.mxu1 %v4127_v49 }
 0x2de   : > { %3498 = vmatpush3.bf16.msra.mxu1 %v4128_v51 }
 0x394   : > { %v2760_v57 = vpop.f32.mrb[0].mxu1 }
 0x395   : > { %v2761_v59 = vadd.f32 %v2760_v57, %v2399_v54  ;;  %v2762_v60 = vpop.f32.mrb[1].mxu1 }
 0x396   : > { %v2763_v62 = vadd.f32 %v2762_v60, %v2403_v55  ;;  %v2764_v63 = vpop.f32.mrb[2].mxu1 }
 0x397   : > { %v2765_v3 = vpop.f32.mrb[3].mxu1 }
 0x39a   : > { %v2801_v58 = vpop.f32.mrb[0].mxu0 }
 0x39b   : > { %v2803_v61 = vpop.f32.mrb[1].mxu0  ;;  %v2802_v2 = vadd.f32 %v2801_v58, %v2761_v59 }
 0x39c   : > { %v2805_v1 = vpop.f32.mrb[2].mxu0  ;;  %v2804_v5 = vadd.f32 %v2803_v61, %v2763_v62 }
 0x39d   : > { %v2806_v4 = vpop.f32.mrb[3].mxu0  ;;  %v2808_v6 = vmax.f32 %v2802_v2, 0.0 }
 0x39e   : > { %v2809_v9 = vmax.f32 %v2804_v5, 0.0 }
 0x39f   : > { %v2810_v11 = vpack.c.bf16 %v2808_v6, %v2808_v6 }
 0x3a0   : > { %v2811_v10 = vpack.c.bf16 %v2809_v9, %v2809_v9 }
 0x3a2   : > { %2979 = vmatprep.mubr.bf16.mxu1 %v2811_v10 }
 0x3a3   : > { %2980 = vmatmul.mubr.bf16.vlgmr.msra.gmra.mrb[4].mxu1 %v2810_v11 }
 0x476   : > { %v3499_v50 = vpop.f32.mrb[4].mxu1 }
 0x477   : > { %v3500_v0 = vpop.f32.mrb[5].mxu1 }
 0x478   : > { %v3501_v12 = vadd.f32 %v3500_v0, %v3499_v50  ;;  %v3502_v13 = vpop.f32.mrb[6].mxu1 }
 0x479   : > { %v3503_v14 = vpop.f32.mrb[7].mxu1 }
 0x47a   : > { %v2982_v15 = vadd.f32 %v3501_v12, %v3459_v56 }
 0x47c   : > { %2987 = vst [vmem:[#allocation15] sm:$0xff] %v2982_v15 }
 0x47d PF: > { %p3575_p5 = scmp.eq.s32.totalorder %s4487_s30, 2  ;;  %s4425_s15 = smov [#allocation15]  }
 0x47e   : > { %s2995_s16 = sshll.u32 %s4425_s15, 4  ;;  %s2996_s16 = int_to_ptr.vmem [resolvable:$true] %s2995_s16 }
 0x47f   : > { %s4327_s22 = scalar_lea.vmem %s2996_s16, 128  ;;  %p4334_p2 = scmp.lt.s32.totalorder %s2996_s16, %s2996_s16 }
 0x480   : > { %p4328_p8 = scmp.ne.s32.totalorder %s2996_s16, %s4327_s22  ;;  %p4335_p9 = scmp.lt.s32.totalorder %s4327_s22, %s4327_s22 }
 0x482   : > { %p4329_p7 = pnand %p4328_p8, %p3575_p5  ;;  %p4336_p6 = por %p4335_p9, %p4334_p2 }
 0x484   : > { %p4330_p13 = pneg %p4329_p7 }
 0x486   : > { %p4337_p3 = pnand %p4336_p6, %p4330_p13 }
 0x488   : > { %4340 = shalt.err (!%p4337_p3)
}
 0x489   : > { %s4341_s20 = scalar_lea.hbm %s5097_s7, 128 }
 0x48a   : > { %p4342_p1 = scmp.ne.s32.totalorder %s5097_s7, %s4341_s20  ;;  %p4347_p12 = scmp.lt.u32.totalorder %s4341_s20, %s5097_s7 }
 0x48c   : > { %p4343_p4 = pnand %p4342_p1, %p3575_p5 }
 0x48e   : > { %p4344_p10 = pneg %p4343_p4 }
 0x490   : > { %p4349_p11 = pnand %p4347_p12, %p4344_p10 }
 0x492   : > { %4352 = shalt.err (!%p4349_p11)
}
 0x493   : > { %3536 = dma.vmem_to_hbm [thread:$0]  (%p3575_p5), %s2996_s16, 128, %s5097_s7, [#allocation5]  }
 0x494   : > { %4390 = dma.done.wait (%p3575_p5), [#allocation5], 128  }
 0x495   : > { %4392 = vsyncadd (%p3575_p5), [#allocation5], 4294967168 }
 0x496 PF: > { %p21_p0 = scmp.ge.s32.totalorder %s4642_s11, 5   ;;  %s5116_s24 = smov %s4399_s25 }
 0x497   : > { %s5117_s25 = smov %s4403_s26  ;;  %s5118_s26 = smov %s4654_s18 }
 0x498   : > { %s5119_s27 = smov %s4642_s11  ;;  %23 = sbr.rel (!%p21_p0) target bundleno = 7 (0x7), region = 119 }
 0x49f   :  { %3008 = vsyncpa [#allocation4], 1 }
 0x4a0   :  { %3010 = vsyncpa [#allocation4 + $0x1], 1 }
 0x4a1   :  { %3011 = vsyncpa [#allocation7], 1 }
 0x4a2   :  { %3013 = vsyncpa [#allocation7 + $0x1], 1 }
 0x4a3   :  { %3014 = vsyncpa [#allocation10], 1 }
 0x4a4   :  { %3015 = vsyncpa [#allocation13], 1 }
 0x4a5   :  { %3016 = vsyncpa [#allocation5], 1 }
 0x4a6   :  { %3018 = vsyncpa [#allocation5 + $0x1], 1 }

</bundles_post_ra>
